<compile_context>
chip_gen: v7x
topology: tpu7x:2x2x1
jax: 0.10.0
libtpu: 0.0.40
codegen_flags: <defaults>
</compile_context>

<pallas_src>
import functools
import math

import jax
import jax.numpy as jnp
from jax.experimental import pallas as pl
from jax.experimental.pallas import tpu as pltpu


# ---------------------------------------------------------------------------
# tiling helpers
# ---------------------------------------------------------------------------

def _pick_tile(dim, target, base):
    """Largest multiple of `base` <= target that exactly divides `dim`, else full dim."""
    t = (min(target, dim) // base) * base
    while t >= base:
        if dim % t == 0:
            return t
        t -= base
    return dim


# ---------------------------------------------------------------------------
# Linear: y = x @ w (+ bias) (+ residual) (+ ReLU)   -- tiled MXU matmul
# ---------------------------------------------------------------------------

def _linear_kernel(*args, n_k, has_bias, has_residual, activation):
    x_ref, w_ref = args[0], args[1]
    i = 2
    b_ref = None
    r_ref = None
    if has_bias:
        b_ref = args[i]
        i += 1
    if has_residual:
        r_ref = args[i]
        i += 1
    o_ref = args[i]
    acc_ref = args[i + 1]

    k = pl.program_id(2)

    @pl.when(k == 0)
    def _init():
        acc_ref[...] = jnp.zeros_like(acc_ref)

    acc_ref[...] += jnp.dot(x_ref[...], w_ref[...], preferred_element_type=jnp.float32)

    @pl.when(k == n_k - 1)
    def _finalize():
        acc = acc_ref[...]
        if has_bias:
            acc = acc + b_ref[...].astype(jnp.float32)
        if has_residual:
            acc = acc + r_ref[...].astype(jnp.float32)
        if activation == "relu":
            acc = jnp.maximum(acc, 0.0)
        o_ref[...] = acc.astype(o_ref.dtype)


def linear(x, w, b=None, residual=None, activation=None,
           tm_target=256, tn_target=256, tk_target=512):
    """x: (M, K), w: (K, N) -> (M, N). Optional fused bias / residual / ReLU."""
    M, K = x.shape
    K2, N = w.shape
    assert K == K2
    tm = _pick_tile(M, tm_target, 8)
    tn = _pick_tile(N, tn_target, 128)
    tk = _pick_tile(K, tk_target, 128)
    n_k = K // tk

    in_specs = [
        pl.BlockSpec((tm, tk), lambda i, j, k: (i, k)),
        pl.BlockSpec((tk, tn), lambda i, j, k: (k, j)),
    ]
    args = [x, w]
    if b is not None:
        in_specs.append(pl.BlockSpec((1, tn), lambda i, j, k: (0, j)))
        args.append(b.reshape(1, N))
    if residual is not None:
        in_specs.append(pl.BlockSpec((tm, tn), lambda i, j, k: (i, j)))
        args.append(residual)

    kernel = functools.partial(
        _linear_kernel, n_k=n_k, has_bias=b is not None,
        has_residual=residual is not None, activation=activation)

    return pl.pallas_call(
        kernel,
        out_shape=jax.ShapeDtypeStruct((M, N), x.dtype),
        grid_spec=pltpu.PrefetchScalarGridSpec(
            num_scalar_prefetch=0,
            grid=(M // tm, N // tn, n_k),
            in_specs=in_specs,
            out_specs=pl.BlockSpec((tm, tn), lambda i, j, k: (i, j)),
            scratch_shapes=[pltpu.VMEM((tm, tn), jnp.float32)],
        ),
        compiler_params=pltpu.CompilerParams(
            dimension_semantics=("parallel", "parallel", "arbitrary")),
    )(*args)


# ---------------------------------------------------------------------------
# LayerNorm (torch-style: unbiased std, divide by (std + eps))
# ---------------------------------------------------------------------------

def _layernorm_kernel(x_ref, g_ref, b_ref, o_ref, *, eps, d):
    x = x_ref[...].astype(jnp.float32)                       # (tm, D)
    mean = jnp.mean(x, axis=-1, keepdims=True)
    xc = x - mean
    var = jnp.sum(xc * xc, axis=-1, keepdims=True) * (1.0 / (d - 1))   # unbiased (ddof=1)
    std = jnp.sqrt(var)
    y = g_ref[...].astype(jnp.float32) * xc / (std + eps) + b_ref[...].astype(jnp.float32)
    o_ref[...] = y.astype(o_ref.dtype)


def layernorm(x, gamma, beta, eps=1e-6, tm_target=512):
    M, D = x.shape
    tm = _pick_tile(M, tm_target, 8)
    kernel = functools.partial(_layernorm_kernel, eps=eps, d=D)
    return pl.pallas_call(
        kernel,
        out_shape=jax.ShapeDtypeStruct((M, D), x.dtype),
        grid_spec=pltpu.PrefetchScalarGridSpec(
            num_scalar_prefetch=0,
            grid=(M // tm,),
            in_specs=[
                pl.BlockSpec((tm, D), lambda i: (i, 0)),
                pl.BlockSpec((1, D), lambda i: (0, 0)),
                pl.BlockSpec((1, D), lambda i: (0, 0)),
            ],
            out_specs=pl.BlockSpec((tm, D), lambda i: (i, 0)),
        ),
        compiler_params=pltpu.CompilerParams(dimension_semantics=("parallel",)),
    )(x, gamma.reshape(1, D), beta.reshape(1, D))


# ---------------------------------------------------------------------------
# Scaled dot-product attention, fused per (batch * head)
# ---------------------------------------------------------------------------

def _attention_kernel(q_ref, k_ref, v_ref, o_ref, *, scale):
    q = q_ref[0].astype(jnp.float32)                          # (T, dk)
    k = k_ref[0].astype(jnp.float32)
    v = v_ref[0].astype(jnp.float32)
    s = jnp.dot(q, k.T, preferred_element_type=jnp.float32) * scale     # (T, T)
    m = jnp.max(s, axis=-1, keepdims=True)
    p = jnp.exp(s - m)
    denom = jnp.sum(p, axis=-1, keepdims=True)
    o = jnp.dot(p / denom, v, preferred_element_type=jnp.float32)       # (T, dk)
    o_ref[0] = o.astype(o_ref.dtype)


def mha_attention(q, k, v):
    """q, k, v: (B*H, T, dk) -> (B*H, T, dk). No mask (Encoder is called with mask=None)."""
    BH, T, dk = q.shape
    kernel = functools.partial(_attention_kernel, scale=1.0 / math.sqrt(dk))
    spec = pl.BlockSpec((1, T, dk), lambda i: (i, 0, 0))
    return pl.pallas_call(
        kernel,
        out_shape=jax.ShapeDtypeStruct((BH, T, dk), q.dtype),
        grid_spec=pltpu.PrefetchScalarGridSpec(
            num_scalar_prefetch=0,
            grid=(BH,),
            in_specs=[spec, spec, spec],
            out_specs=spec,
        ),
        compiler_params=pltpu.CompilerParams(dimension_semantics=("parallel",)),
    )(q, k, v)


# ---------------------------------------------------------------------------
# AdaptiveConcatPoolRNN: [avg | max | last] over time
# ---------------------------------------------------------------------------

def _concat_pool_kernel(x_ref, o_ref, sum_sc, max_sc, *, inv_t):
    # x_ref: (TB, C, TT) tile; o_ref: (3, TB, C) resident across time axis
    t = pl.program_id(1)
    nt = pl.num_programs(1)

    @pl.when(t == 0)
    def _init():
        sum_sc[...] = jnp.zeros_like(sum_sc)
        max_sc[...] = jnp.full_like(max_sc, -jnp.inf)

    x = x_ref[...]
    sum_sc[...] += jnp.sum(x, axis=-1, dtype=jnp.float32)
    max_sc[...] = jnp.maximum(max_sc[...], jnp.max(x, axis=-1).astype(jnp.float32))

    @pl.when(t == nt - 1)
    def _finalize():
        o_ref[0] = (sum_sc[...] * inv_t).astype(o_ref.dtype)   # avg pool
        o_ref[1] = max_sc[...].astype(o_ref.dtype)             # max pool
        o_ref[2] = x[:, :, -1].astype(o_ref.dtype)             # last timestep


def _choose_pool_tiles(B, C, T, itemsize):
    t_tile = T
    for cand in (2048, 1024, 512, 256, 128):
        if cand <= T and T % cand == 0:
            t_tile = cand
            break
    target_bytes = 4 * 1024 * 1024
    tb = max(1, target_bytes // max(1, C * t_tile * itemsize))
    tb = min(tb, B)
    if tb < B:
        tb = min(max(8, (tb // 8) * 8), B)
    return tb, t_tile


def adaptive_concat_pool_rnn(x, bidirectional=False):
    """x: (B, C, T) -> (B, 3*C) = [avg_pool | max_pool | last].
    With bidirectional=True the torch module's x[:, channels:, 0] slice is empty
    (channels == C), so the result is identical to the unidirectional branch."""
    del bidirectional
    B, C, T = x.shape
    itemsize = jnp.dtype(x.dtype).itemsize
    tb, t_tile = _choose_pool_tiles(B, C, T, itemsize)

    kernel = functools.partial(_concat_pool_kernel, inv_t=1.0 / T)
    out3 = pl.pallas_call(
        kernel,
        out_shape=jax.ShapeDtypeStruct((3, B, C), x.dtype),
        grid_spec=pltpu.PrefetchScalarGridSpec(
            num_scalar_prefetch=0,
            grid=(pl.cdiv(B, tb), T // t_tile),
            in_specs=[pl.BlockSpec((tb, C, t_tile), lambda b, t: (b, 0, t))],
            out_specs=pl.BlockSpec((3, tb, C), lambda b, t: (0, b, 0)),
            scratch_shapes=[
                pltpu.VMEM((tb, C), jnp.float32),   # running sum
                pltpu.VMEM((tb, C), jnp.float32),   # running max
            ],
        ),
        compiler_params=pltpu.CompilerParams(
            dimension_semantics=("parallel", "arbitrary")),
    )(x)
    return jnp.transpose(out3, (1, 0, 2)).reshape(B, 3 * C)


# ---------------------------------------------------------------------------
# Wrapper glue (elementwise, layout) + full MF_Transformer forward
# ---------------------------------------------------------------------------

def _positional_encoding(seq_len, d_model, dtype=jnp.float32):
    position = jnp.arange(seq_len, dtype=jnp.float32)[:, None]
    div_term = jnp.exp(jnp.arange(0, d_model, 2, dtype=jnp.float32)
                       * (-math.log(10000.0) / d_model))
    ang = position * div_term
    pe = jnp.zeros((seq_len, d_model), dtype=jnp.float32)
    pe = pe.at[:, 0::2].set(jnp.sin(ang))
    pe = pe.at[:, 1::2].set(jnp.cos(ang))
    return pe.astype(dtype)


def _batchnorm_eval(x, gamma, beta, mean, var, eps=1e-5):
    # BatchNorm1d in eval mode (running stats); trivial elementwise glue.
    return (x - mean) / jnp.sqrt(var + eps) * gamma + beta


def mf_transformer_forward(params, x, *, n_embed, hz, n_head, concat_pool):
    """Full MF_Transformer forward (eval mode). x: (B, n_embed, slen) or (B, slen, n_embed)."""
    if x.shape[1] == n_embed:
        x = jnp.transpose(x, (0, 2, 1))
    B, slen, ch = x.shape
    assert slen % hz == 0
    T = slen // hz
    n_input = ch * hz
    seg = x.reshape(B, T, n_input)                       # Segmentation('fix')

    d = params["input_embed_w"].shape[1]
    dk = d // n_head

    h = linear(seg.reshape(B * T, n_input), params["input_embed_w"])      # input_embed (no bias)
    pe = _positional_encoding(T, d, h.dtype)
    h = (h.reshape(B, T, d) + pe[None]).reshape(B * T, d)                 # PositionalEncoding

    def split_heads(t):   # (B*T, d) -> (B*H, T, dk)
        return t.reshape(B, T, n_head, dk).transpose(0, 2, 1, 3).reshape(B * n_head, T, dk)

    def merge_heads(t):   # (B*H, T, dk) -> (B*T, d)
        return t.reshape(B, n_head, T, dk).transpose(0, 2, 1, 3).reshape(B * T, d)

    for lyr in params["layers"]:
        # sublayer 0: x + self_attn(norm(x))
        hn = layernorm(h, lyr["ln1_g"], lyr["ln1_b"])
        q = linear(hn, lyr["wq"], lyr["bq"])
        k = linear(hn, lyr["wk"], lyr["bk"])
        v = linear(hn, lyr["wv"], lyr["bv"])
        attn = mha_attention(split_heads(q), split_heads(k), split_heads(v))
        h = linear(merge_heads(attn), lyr["wo"], lyr["bo"], residual=h)
        # sublayer 1: x + ffn(norm(x))
        hn = layernorm(h, lyr["ln2_g"], lyr["ln2_b"])
        ff = linear(hn, lyr["w1"], lyr["b1"], activation="relu")
        h = linear(ff, lyr["w2"], lyr["b2"], residual=h)

    h = layernorm(h, params["lnf_g"], params["lnf_b"])                    # Encoder final norm
    feats = jnp.transpose(h.reshape(B, T, d), (0, 2, 1))                  # (B, d_model, T)

    if concat_pool:
        pooled = adaptive_concat_pool_rnn(feats)                          # (B, 3*d_model)
    else:
        pooled = feats[:, :, -1]                                          # LastPoolRNN(False)

    z = _batchnorm_eval(pooled, params["bn1_g"], params["bn1_b"], params["bn1_m"], params["bn1_v"])
    z = linear(z, params["cfc_w"], params["cfc_b"], activation="relu")    # concat_fc (dropout off)
    z = _batchnorm_eval(z, params["bn2_g"], params["bn2_b"], params["bn2_m"], params["bn2_v"])
    return linear(z, params["fc_w"], params["fc_b"])                      # classifier head


# TODO(synk): Segmentation's 'rpeak' branch (host-side numpy R-peak detector loop over each
# record) has no clean Pallas equivalent; only the 'fix' segmentation path is implemented.
# Dropout layers are identity here (eval / inference forward).


# ---------------------------------------------------------------------------
# Parameter init + pure-JAX reference (mirrors the PyTorch forward)
# ---------------------------------------------------------------------------

def init_params(key, *, n_embed, hz, d_model, n_head, d_ff, n_layers, n_output, concat_pool):
    n_input = n_embed * hz
    state = {"k": key}

    def nk():
        state["k"], sub = jax.random.split(state["k"])
        return sub

    def dense(fan_in, fan_out):
        lim = 1.0 / math.sqrt(fan_in)
        w = jax.random.uniform(nk(), (fan_in, fan_out), jnp.float32, -lim, lim)
        b = jax.random.uniform(nk(), (fan_out,), jnp.float32, -lim, lim)
        return w, b

    def ln_params(dim):
        return (1.0 + 0.1 * jax.random.normal(nk(), (dim,), jnp.float32),
                0.1 * jax.random.normal(nk(), (dim,), jnp.float32))

    def bn_params(dim):
        return (1.0 + 0.1 * jax.random.normal(nk(), (dim,), jnp.float32),
                0.1 * jax.random.normal(nk(), (dim,), jnp.float32),
                0.1 * jax.random.normal(nk(), (dim,), jnp.float32),
                jax.random.uniform(nk(), (dim,), jnp.float32, 0.5, 1.5))

    params = {"input_embed_w": dense(n_input, d_model)[0], "layers": []}
    for _ in range(n_layers):
        lyr = {}
        lyr["ln1_g"], lyr["ln1_b"] = ln_params(d_model)
        lyr["wq"], lyr["bq"] = dense(d_model, d_model)
        lyr["wk"], lyr["bk"] = dense(d_model, d_model)
        lyr["wv"], lyr["bv"] = dense(d_model, d_model)
        lyr["wo"], lyr["bo"] = dense(d_model, d_model)
        lyr["ln2_g"], lyr["ln2_b"] = ln_params(d_model)
        lyr["w1"], lyr["b1"] = dense(d_model, d_ff)
        lyr["w2"], lyr["b2"] = dense(d_ff, d_model)
        params["layers"].append(lyr)
    params["lnf_g"], params["lnf_b"] = ln_params(d_model)
    mult = 3 if concat_pool else 1
    params["bn1_g"], params["bn1_b"], params["bn1_m"], params["bn1_v"] = bn_params(mult * d_model)
    params["cfc_w"], params["cfc_b"] = dense(mult * d_model, d_model)
    params["bn2_g"], params["bn2_b"], params["bn2_m"], params["bn2_v"] = bn_params(d_model)
    params["fc_w"], params["fc_b"] = dense(d_model, n_output)
    return params


def reference_forward(params, x, *, n_embed, hz, n_head, concat_pool):
    if x.shape[1] == n_embed:
        x = jnp.transpose(x, (0, 2, 1))
    B, slen, ch = x.shape
    T = slen // hz
    seg = x.reshape(B, T, ch * hz)
    d = params["input_embed_w"].shape[1]
    dk = d // n_head

    h = seg @ params["input_embed_w"]
    h = h + _positional_encoding(T, d, h.dtype)[None]

    def ln(t, g, b, eps=1e-6):
        mean = jnp.mean(t, axis=-1, keepdims=True)
        std = jnp.std(t, axis=-1, keepdims=True, ddof=1)
        return g * (t - mean) / (std + eps) + b

    for lyr in params["layers"]:
        hn = ln(h, lyr["ln1_g"], lyr["ln1_b"])
        q = hn @ lyr["wq"] + lyr["bq"]
        k = hn @ lyr["wk"] + lyr["bk"]
        v = hn @ lyr["wv"] + lyr["bv"]

        def split(t):
            return t.reshape(B, T, n_head, dk).transpose(0, 2, 1, 3)

        qh, kh, vh = split(q), split(k), split(v)
        s = (qh @ jnp.swapaxes(kh, -1, -2)) / math.sqrt(dk)
        p = jax.nn.softmax(s, axis=-1)
        o = (p @ vh).transpose(0, 2, 1, 3).reshape(B, T, d)
        h = h + (o @ lyr["wo"] + lyr["bo"])
        hn = ln(h, lyr["ln2_g"], lyr["ln2_b"])
        ff = jax.nn.relu(hn @ lyr["w1"] + lyr["b1"])
        h = h + (ff @ lyr["w2"] + lyr["b2"])

    h = ln(h, params["lnf_g"], params["lnf_b"])
    feats = jnp.transpose(h, (0, 2, 1))
    if concat_pool:
        pooled = jnp.concatenate([jnp.mean(feats, -1), jnp.max(feats, -1), feats[:, :, -1]], axis=1)
    else:
        pooled = feats[:, :, -1]
    z = _batchnorm_eval(pooled, params["bn1_g"], params["bn1_b"], params["bn1_m"], params["bn1_v"])
    z = jax.nn.relu(z @ params["cfc_w"] + params["cfc_b"])
    z = _batchnorm_eval(z, params["bn2_g"], params["bn2_b"], params["bn2_m"], params["bn2_v"])
    return z @ params["fc_w"] + params["fc_b"]


# ---------------------------------------------------------------------------
# main
# ---------------------------------------------------------------------------

if __name__ == "__main__":
    key = jax.random.PRNGKey(0)
    k_x, k_p, k_m1, k_m2, k_m3, k_m4, k_pool = jax.random.split(key, 7)

    ok = True

    # --- unit checks exercising the tiled / accumulator paths -------------------------
    xm = jax.random.normal(k_m1, (128, 1024), jnp.float32)
    wm = jax.random.normal(k_m2, (1024, 256), jnp.float32) * 0.03
    bm = jax.random.normal(k_m3, (256,), jnp.float32) * 0.1
    rm = jax.random.normal(k_m4, (128, 256), jnp.float32)
    got = jax.block_until_ready(linear(xm, wm, bm, residual=rm, activation="relu"))
    ref = jax.nn.relu(xm @ wm + bm + rm)
    ok &= bool(jnp.allclose(got, ref, atol=1e-3, rtol=1e-3))

    xp = jax.random.normal(k_pool, (16, 128, 384), jnp.float32)
    got = jax.block_until_ready(adaptive_concat_pool_rnn(xp))
    refp = jnp.concatenate([jnp.mean(xp, -1), jnp.max(xp, -1), xp[:, :, -1]], axis=1)
    ok &= bool(jnp.allclose(got, refp, atol=1e-4, rtol=1e-4))

    # --- full MF_Transformer forward at small shapes -----------------------------------
    # config: n_embed=4 input channels, hz=8, slen=64 -> T=8 segmented steps,
    #         d_model=n_hidden=32, 4 heads (d_k=8), d_ff=64, 2 layers, 5 classes
    cfg = dict(n_embed=4, hz=8, d_model=32, n_head=4, d_ff=64, n_layers=2, n_output=5)
    B, slen = 2, 64
    x = jax.random.normal(k_x, (B, cfg["n_embed"], slen), jnp.float32)

    for concat_pool in (True, False):   # AdaptiveConcatPoolRNN vs LastPoolRNN
        params = init_params(
            k_p, n_embed=cfg["n_embed"], hz=cfg["hz"], d_model=cfg["d_model"],
            n_head=cfg["n_head"], d_ff=cfg["d_ff"], n_layers=cfg["n_layers"],
            n_output=cfg["n_output"], concat_pool=concat_pool)
        out = jax.block_until_ready(
            mf_transformer_forward(params, x, n_embed=cfg["n_embed"], hz=cfg["hz"],
                                   n_head=cfg["n_head"], concat_pool=concat_pool))
        ref = reference_forward(params, x, n_embed=cfg["n_embed"], hz=cfg["hz"],
                                n_head=cfg["n_head"], concat_pool=concat_pool)
        ok &= (out.shape == (B, cfg["n_output"]))
        ok &= bool(jnp.allclose(out, ref, atol=2e-3, rtol=2e-3))

    if ok:
        print("KERNEL_OK")
    else:
        print("MISMATCH")
</pallas_src>

<mosaic_0001>
module attributes {stable_mosaic.version = 11 : i64} {
  func.func @_linear_kernel(%arg0: i32, %arg1: i32, %arg2: i32, %arg3: memref<128x512xf32, #tpu.memory_space<vmem>>, %arg4: memref<512x256xf32, #tpu.memory_space<vmem>>, %arg5: memref<1x256xf32, #tpu.memory_space<vmem>>, %arg6: memref<128x256xf32, #tpu.memory_space<vmem>>, %arg7: memref<128x256xf32, #tpu.memory_space<vmem>>, %arg8: memref<128x256xf32, #tpu.memory_space<vmem>>) attributes {dimension_semantics = [#tpu.dimension_semantics<parallel>, #tpu.dimension_semantics<parallel>, #tpu.dimension_semantics<arbitrary>], iteration_bounds = array<i64: 1, 1, 2>, scalar_prefetch = 0 : i64, scratch_operands = 1 : i64, tpu.core_type = #tpu.core_type<tc>, window_params = [{transform_indices = @transform_0, window_bounds = array<i64: 128, 512>}, {transform_indices = @transform_1, window_bounds = array<i64: 512, 256>}, {transform_indices = @transform_2, window_bounds = array<i64: 1, 256>}, {transform_indices = @transform_3, window_bounds = array<i64: 128, 256>}, {transform_indices = @transform_4, window_bounds = array<i64: 128, 256>}]} {
    %c0_i32 = arith.constant 0 : i32
    %0 = arith.cmpi eq, %arg2, %c0_i32 : i32
    %1 = arith.extui %0 : i1 to i32
    %c0_i32_0 = arith.constant 0 : i32
    %2 = arith.cmpi ne, %1, %c0_i32_0 : i32
    scf.if %2 {
      %cst_9 = arith.constant 0.000000e+00 : f32
      %12 = vector.broadcast %cst_9 : f32 to vector<128x256xf32>
      %c0_10 = arith.constant 0 : index
      %c0_11 = arith.constant 0 : index
      %13 = vector.load %arg8[%c0_10, %c0_11] : memref<128x256xf32, #tpu.memory_space<vmem>>, vector<128x256xf32>
      tpu.vector_store %arg8[%c0_10, %c0_11], %12 {strides = array<i32>} : memref<128x256xf32, #tpu.memory_space<vmem>>, vector<128x256xf32>,
    } else {
    }
    %c0 = arith.constant 0 : index
    %c0_1 = arith.constant 0 : index
    %3 = vector.load %arg8[%c0, %c0_1] : memref<128x256xf32, #tpu.memory_space<vmem>>, vector<128x256xf32>
    %c0_2 = arith.constant 0 : index
    %c0_3 = arith.constant 0 : index
    %4 = vector.load %arg3[%c0_2, %c0_3] : memref<128x512xf32, #tpu.memory_space<vmem>>, vector<128x512xf32>
    %c0_4 = arith.constant 0 : index
    %c0_5 = arith.constant 0 : index
    %5 = vector.load %arg4[%c0_4, %c0_5] : memref<512x256xf32, #tpu.memory_space<vmem>>, vector<512x256xf32>
    %cst = arith.constant dense<0.000000e+00> : vector<128x256xf32>
    %6 = tpu.matmul %4, %5, %cst {dimension_numbers = #tpu.dot_dimension_numbers<[1], [0], [0], [1], [0, 0, 1, 1], [], []>} : vector<128x512xf32>, vector<512x256xf32>, vector<128x256xf32> -> vector<128x256xf32>
    %7 = arith.addf %3, %6 : vector<128x256xf32>
    %c0_6 = arith.constant 0 : index
    %c0_7 = arith.constant 0 : index
    %8 = vector.load %arg8[%c0_6, %c0_7] : memref<128x256xf32, #tpu.memory_space<vmem>>, vector<128x256xf32>
    tpu.vector_store %arg8[%c0_6, %c0_7], %7 {strides = array<i32>} : memref<128x256xf32, #tpu.memory_space<vmem>>, vector<128x256xf32>,
    %c1_i32 = arith.constant 1 : i32
    %9 = arith.cmpi eq, %arg2, %c1_i32 : i32
    %10 = arith.extui %9 : i1 to i32
    %c0_i32_8 = arith.constant 0 : i32
    %11 = arith.cmpi ne, %10, %c0_i32_8 : i32
    scf.if %11 {
      %c0_9 = arith.constant 0 : index
      %c0_10 = arith.constant 0 : index
      %12 = vector.load %arg8[%c0_9, %c0_10] : memref<128x256xf32, #tpu.memory_space<vmem>>, vector<128x256xf32>
      %c0_11 = arith.constant 0 : index
      %c0_12 = arith.constant 0 : index
      %13 = vector.load %arg5[%c0_11, %c0_12] : memref<1x256xf32, #tpu.memory_space<vmem>>, vector<1x256xf32>
      %14 = vector.broadcast %13 : vector<1x256xf32> to vector<128x256xf32>
      %15 = arith.addf %12, %14 : vector<128x256xf32>
      %c0_13 = arith.constant 0 : index
      %c0_14 = arith.constant 0 : index
      %16 = vector.load %arg6[%c0_13, %c0_14] : memref<128x256xf32, #tpu.memory_space<vmem>>, vector<128x256xf32>
      %17 = arith.addf %15, %16 : vector<128x256xf32>
      %cst_15 = arith.constant 0.000000e+00 : f32
      %18 = vector.broadcast %cst_15 : f32 to vector<128x256xf32>
      %19 = arith.maximumf %17, %18 : vector<128x256xf32>
      %c0_16 = arith.constant 0 : index
      %c0_17 = arith.constant 0 : index
      %20 = vector.load %arg7[%c0_16, %c0_17] : memref<128x256xf32, #tpu.memory_space<vmem>>, vector<128x256xf32>
      tpu.vector_store %arg7[%c0_16, %c0_17], %19 {strides = array<i32>} : memref<128x256xf32, #tpu.memory_space<vmem>>, vector<128x256xf32>,
    } else {
    }
    return
  }
  func.func @transform_0(%arg0: i32, %arg1: i32, %arg2: i32) -> (i32, i32) {
    %c0_i32 = arith.constant 0 : i32
    return %arg0, %arg2 : i32, i32
  }
  func.func @transform_1(%arg0: i32, %arg1: i32, %arg2: i32) -> (i32, i32) {
    %c0_i32 = arith.constant 0 : i32
    return %arg2, %arg1 : i32, i32
  }
  func.func @transform_2(%arg0: i32, %arg1: i32, %arg2: i32) -> (i32, i32) {
    %c0_i32 = arith.constant 0 : i32
    %c0_i32_0 = arith.constant 0 : i32
    return %c0_i32, %arg1 : i32, i32
  }
  func.func @transform_3(%arg0: i32, %arg1: i32, %arg2: i32) -> (i32, i32) {
    %c0_i32 = arith.constant 0 : i32
    return %arg0, %arg1 : i32, i32
  }
  func.func @transform_4(%arg0: i32, %arg1: i32, %arg2: i32) -> (i32, i32) {
    %c0_i32 = arith.constant 0 : i32
    return %arg0, %arg1 : i32, i32
  }
}

</mosaic_0001>

<bundles_post_ra>
// kernel: tpu_custom_call.1
= control target key start
LH: loop header
LB: loop body
LE: loop exit
PB: predicated region body
PF: predicated region fallthrough
CT: control target
= control target key end

     0   :  { %s2277_s0 = inlined_call_operand.hbm [shape: f32[128,1024], index: 0, kind: input, shape index: {}]   ;;  %s2278_s1 = inlined_call_operand.hbm [shape: f32[1024,256], index: 1, kind: input, shape index: {}]   ;;  %s2279_s2 = inlined_call_operand.vmem [shape: f32[1,256], index: 2, kind: input, shape index: {}]   ;;  %s2280_s3 = inlined_call_operand.hbm [shape: f32[128,256], index: 3, kind: input, shape index: {}]   ;;  %s2281_s4 = inlined_call_operand.hbm [shape: f32[128,256], index: 4, kind: output, shape index: {}]  }
   0x1   :  { %2288 = sst [smem:[#allocation14_spill]] %s2277_s0 }
   0x2   :  { %2289 = sst [smem:[#allocation15_spill]] %s2280_s3 }
   0x3   :  { %9 = vsyncpa [#allocation4], 0 }
   0x4   :  { %11 = vsyncpa [#allocation4 + $0x1], 0 }
   0x5   :  { %12 = vsyncpa [#allocation7], 0 }
   0x6   :  { %14 = vsyncpa [#allocation7 + $0x1], 0 }
   0x7   :  { %15 = vsyncpa [#allocation5], 0  ;;  %s1811_s15 = smov 0   ;;  %s1813_s16 = smov 0  }
   0x8   :  { %s1815_s17 = smov 0   ;;  %s1817_s18 = smov 0  }
   0x9   :  { %s1819_s19 = smov 0   ;;  %s1821_s20 = smov 0  }
   0xa LB: > { %s1840_s21 = sadd.s32 4294967295, %s1772_s20   ;;  %s49_s22 = sadd.s32 1, %s1760_s17  ;;  %s1772_s20 = sphi %s1821_s20, %s21_s20   ;;  %s1768_s19 = sphi %s1819_s19, %s2307_s19   ;;  %s1764_s18 = sphi %s1817_s18, %s2306_s18   ;;  %s1760_s17 = sphi %s1815_s17, %s2305_s17   ;;  %s1756_s16 = sphi %s1813_s16, %s2304_s16   ;;  %s1752_s15 = sphi %s1811_s15, %s2303_s15  }
   0xb   : > { %p56_p0 = scmp.ne.s32.totalorder %s1760_s17, %s1756_s16  ;;  %p57_p1 = scmp.eq.s32.totalorder %s1772_s20, 0 }
   0xc   : > { %p62_p2 = scmp.ne.s32.totalorder %s1756_s16, %s1752_s15  ;;  %p2282_p3 = scmp.eq.s32.totalorder %s1840_s21, 0 }
   0xd   : > { %p58_p4 = por %p57_p1, %p56_p0  ;;  %p1326_p5 = scmp.ge.s32.totalorder %s1772_s20, 1 }
   0xe   : > { %p1851_p6 = por %p2282_p3, %p62_p2  ;;  %p183_p7 = scmp.lt.s32.totalorder %s1772_s20, 3 }
   0xf   : > { %s1774_s25 = smov [#allocation8]   ;;  %p1534_p10 = scmp.lt.s32.totalorder %s1772_s20, 2 }
  0x10   : > { %s2290_s23 = scalar_select %p1851_p6, 1, 0 }
  0x11   : > { %p1856_p8 = pnand %p1326_p5, %p183_p7  ;;  %s209_s26 = sshll.u32 %s1774_s25, 4  ;;  %s210_s26 = int_to_ptr.vmem [resolvable:$true] %s209_s26 }
  0x12   : > { %p1869_p12 = pnand %p1534_p10, %p58_p4  ;;  %s33_s29 = sadd.s32 1, %s1768_s19 }
  0x13   : > { %s2291_s24 = scalar_select %p1856_p8, 1, 0 }
  0x14   : > { %p1522_p9 = pneg %p1856_p8  ;;  %s2294_s3 = sld [smem:[#allocation15_spill]] }
  0x15   : > { %s2293_s28 = scalar_select %p1869_p12, 1, 0 }
  0x16   : > { %p1865_p11 = pnand %p1522_p9, %p2282_p3 }
  0x18   : > { %p1598_p0 = pneg %p1865_p11 }
  0x1a   : > { %s1596_s6 = scalar_lea.hbm %s2294_s3, 4096 }
  0x1b   : > { %p1597_p13 = scmp.ne.s32.totalorder %s2294_s3, %s1596_s6  ;;  %p1603_p4 = scmp.lt.u32.totalorder %s1596_s6, %s2294_s3 }
  0x1d   : > { %p1599_p1 = pnand %p1598_p0, %p1597_p13 }
  0x1f   : > { %p1600_p2 = pneg %p1599_p1 }
  0x21   : > { %p1605_p5 = pnand %p1603_p4, %p1600_p2 }
  0x23   : > { %1608 = shalt.err (!%p1605_p5)
}
  0x24   : > { %s1609_s11 = scalar_lea.vmem %s210_s26, 4096  ;;  %p1617_p3 = scmp.lt.s32.totalorder %s210_s26, %s210_s26 }
  0x25   : > { %p1610_p7 = scmp.ne.s32.totalorder %s210_s26, %s1609_s11  ;;  %p1618_p6 = scmp.lt.s32.totalorder %s1609_s11, %s1609_s11 }
  0x27   : > { %p1612_p9 = pnand %p1610_p7, %p1598_p0  ;;  %p1619_p8 = por %p1618_p6, %p1617_p3 }
  0x29   : > { %p1613_p10 = pneg %p1612_p9 }
  0x2b   : > { %p1620_p12 = pnand %p1619_p8, %p1613_p10 }
  0x2d   : > { %1623 = shalt.err (!%p1620_p12)
}
  0x2e   : > { %s2286_s12 = smov 256   ;;  %s2287_s13 = smov 16  }
  0x2f   : > { %1525 = dma.hbm_to_vmem [thread:$0]  (!%p1865_p11), %s2294_s3, 4096, %s210_s26, [#allocation7], %s2286_s12, %s2286_s12, %s2287_s13  }
  0x30   : > { %p34_p3 = scmp.ge.s32.totalorder %s33_s29, 2  ;;  %s1894_s25 = sand.u32 1, %s1760_s17  }
  0x31   : > { %s1347_s30 = sshll.u32 %s1768_s19, 9  ;;  %s1330_s5 = sshll.u32 %s1894_s25, 9 }
  0x32   : > { %s2309_s29 = smov (%p34_p3, %s33_s29), 0  ;;  %s2295_s0 = sld [smem:[#allocation14_spill]] }
  0x33   : > { %s45_s27 = ssub.s32 %s1768_s19, %s2309_s29  ;;  %s227_s26 = scalar_lea.vmem [#allocation3], %s1330_s5 }
  0x34   : > { %p47_p6 = scmp.eq.s32.totalorder %s45_s27, 0  ;;  %s237_s9 = sshll.u32 %s227_s26, 4  ;;  %s1912_s9 = int_to_ptr.vmem [resolvable:$true] %s237_s9 }
  0x35   : > { %s247_s11 = sand.u32 1, %s1772_s20   ;;  %s224_s14 = scalar_lea.sflag [#allocation4], %s1894_s25 }
  0x36   : > { %s1910_s10 = scalar_select %p47_p6, %s1760_s17, %s49_s22  }
  0x37   : > { %p2296_p11 = scmp.ne.s32.totalorder %s2293_s28, 0 }
  0x38   : > { %s1905_s8 = scalar_lea.hbm %s2295_s0, %s1347_s30  ;;  %s1629_s5 = scalar_lea.hbm %s2295_s0, 16384 }
  0x39   : > { %s1624_s15 = scalar_lea.hbm %s1905_s8, 8192  ;;  %p1626_p12 = pneg %p2296_p11 }
  0x3a   : > { %p1625_p8 = scmp.ne.s32.totalorder %s1905_s8, %s1624_s15  ;;  %p1630_p1 = scmp.lt.u32.totalorder %s1905_s8, %s2295_s0 }
  0x3b   : > { %p1631_p2 = scmp.lt.u32.totalorder %s1629_s5, %s1624_s15  ;;  %p1633_p5 = scmp.lt.u32.totalorder %s1624_s15, %s1905_s8 }
  0x3c   : > { %p1627_p13 = pnand %p1626_p12, %p1625_p8 }
  0x3d   : > { %p1632_p4 = por %p1631_p2, %p1630_p1 }
  0x3e   : > { %p1628_p0 = pneg %p1627_p13 }
  0x3f   : > { %p1634_p7 = por %p1633_p5, %p1632_p4 }
  0x41   : > { %p1635_p9 = pnand %p1634_p7, %p1628_p0 }
  0x43   : > { %1638 = shalt.err (!%p1635_p9)
}
  0x44   : > { %s1639_s22 = scalar_lea.vmem %s1912_s9, 8192  ;;  %s1777_s26 = smov [#allocation3]  }
  0x45   : > { %p1640_p10 = scmp.ne.s32.totalorder %s1912_s9, %s1639_s22  ;;  %s1644_s30 = sshll.u32 %s1777_s26, 4  ;;  %s1645_s30 = int_to_ptr.vmem [resolvable:$false] %s1644_s30 }
  0x46   : > { %s1646_s27 = scalar_lea.vmem %s1645_s30, 16384  ;;  %p1647_p8 = scmp.lt.s32.totalorder %s1912_s9, %s1645_s30 }
  0x47   : > { %p1642_p3 = pnand %p1640_p10, %p1626_p12  ;;  %p1648_p13 = scmp.lt.s32.totalorder %s1646_s27, %s1639_s22 }
  0x49   : > { %p1643_p6 = pneg %p1642_p3  ;;  %p1649_p1 = por %p1648_p13, %p1647_p8 }
  0x4b   : > { %p1650_p2 = pnand %p1649_p1, %p1643_p6 }
  0x4d   : > { %1653 = shalt.err (!%p1650_p2)
}
  0x4e   : > { %s1778_s15 = smov 1024   ;;  %s1779_s5 = smov 512  }
  0x4f   : > { %s1780_s6 = smov 32   ;;  %s1333_s7 = sshll.u32 %s1894_s25, 10 }
  0x50   : > { %1529 = dma.hbm_to_vmem [thread:$0]  (!%p2296_p11), %s1905_s8, 8192, %s1912_s9, %s224_s14, %s1778_s15, %s1779_s5, %s1780_s6  }
  0x51   : > { %s1349_s26 = sshll.u32 %s1768_s19, 14  ;;  %s251_s12 = scalar_lea.vmem [#allocation6], %s1333_s7 }
  0x52   : > { %s1948_s27 = scalar_lea.hbm %s2278_s1, %s1349_s26  ;;  %s261_s13 = sshll.u32 %s251_s12, 4  ;;  %s1950_s13 = int_to_ptr.vmem [resolvable:$true] %s261_s13 }
  0x53   : > { %s1954_s0 = scalar_lea.sflag [#allocation7], %s247_s11  ;;  %s1654_s3 = scalar_lea.hbm %s1948_s27, 16384 }
  0x54   : > { %p1655_p0 = scmp.ne.s32.totalorder %s1948_s27, %s1654_s3  ;;  %s1659_s9 = scalar_lea.hbm %s2278_s1, 32768 }
  0x55   : > { %p1660_p7 = scmp.lt.u32.totalorder %s1948_s27, %s2278_s1  ;;  %p1661_p9 = scmp.lt.u32.totalorder %s1659_s9, %s1654_s3 }
  0x56   : > { %p1657_p4 = pnand %p1655_p0, %p1626_p12  ;;  %p1663_p3 = scmp.lt.u32.totalorder %s1654_s3, %s1948_s27 }
  0x57   : > { %p1662_p10 = por %p1661_p9, %p1660_p7 }
  0x58   : > { %p1658_p5 = pneg %p1657_p4 }
  0x59   : > { %p1664_p6 = por %p1663_p3, %p1662_p10 }
  0x5b   : > { %p1665_p8 = pnand %p1664_p6, %p1658_p5 }
  0x5d   : > { %1668 = shalt.err (!%p1665_p8)
}
  0x5e   : > { %s1669_s12 = scalar_lea.vmem %s1950_s13, 16384  ;;  %s1781_s11 = smov [#allocation6]  }
  0x5f   : > { %p1670_p13 = scmp.ne.s32.totalorder %s1950_s13, %s1669_s12  ;;  %s1674_s5 = sshll.u32 %s1781_s11, 4  ;;  %s1675_s5 = int_to_ptr.vmem [resolvable:$false] %s1674_s5 }
  0x60   : > { %s1676_s6 = scalar_lea.vmem %s1675_s5, 32768  ;;  %p1677_p0 = scmp.lt.s32.totalorder %s1950_s13, %s1675_s5 }
  0x61   : > { %p1672_p1 = pnand %p1670_p13, %p1626_p12  ;;  %p1678_p4 = scmp.lt.s32.totalorder %s1676_s6, %s1669_s12 }
  0x63   : > { %p1673_p2 = pneg %p1672_p1  ;;  %p1679_p7 = por %p1678_p4, %p1677_p0 }
  0x65   : > { %p1680_p9 = pnand %p1679_p7, %p1673_p2 }
  0x67   : > { %1683 = shalt.err (!%p1680_p9)
}
  0x68   : > { %s2297_s3 = smov 16   ;;  %s2298_s7 = smov 256  }
  0x69   : > { %1532 = dma.hbm_to_vmem [thread:$0]  (!%p2296_p11), %s1948_s27, 16384, %s1950_s13, %s1954_s0, %s2298_s7, %s2298_s7, %s2297_s3  }
  0x6a   : > { %p2299_p12 = scmp.ne.s32.totalorder %s2291_s24, 0 }
  0x6b   : > { %s275_s26 = sand.u32 (!%p2299_p12), 1, %s1756_s16   ;;  %p2300_p5 = scmp.ne.s32.totalorder (!%p2299_p12), %s2290_s23, 0 }
  0x6c   : > { %273 = sbr.rel (%p2299_p12) target bundleno = 530 (0x212), region = 36  ;;  %s1338_s22 = sshll.u32 (!%p2299_p12), %s275_s26, 9 }
  0x6d   : > { %s276_s30 = scalar_lea.sflag (!%p2299_p12), [#allocation4], %s275_s26  ;;  %s1986_s25 = scalar_lea.vmem (!%p2299_p12), [#allocation3], %s1338_s22 }
  0x73   : > { %1735 = dma.done.wait (%p2300_p5), %s276_s30, 8192  }
  0x74   : > { %1737 = vsyncadd (%p2300_p5), %s276_s30, 4294959104  ;;  %s284_s28 = sand.u32 1, %s1840_s21   ;;  %s1339_s8 = sshll.u32 %s275_s26, 10 }
  0x75   : > { %s285_s0 = scalar_lea.sflag [#allocation7], %s284_s28  ;;  %s1993_s13 = scalar_lea.vmem [#allocation6], %s1339_s8 }
  0x76   : > { %1739 = dma.done.wait (%p2300_p5), %s285_s0, 16384  }
  0x77   : > { %1741 = vsyncadd (%p2300_p5), %s285_s0, 4294950912  ;;  %p2301_p11 = scmp.eq.s32.totalorder %s1840_s21, 0 }
  0x79   : > { %1743 = dma.done.wait (%p2301_p11), [#allocation7], 4096   ;;  %p2302_p10 = pmov %p2301_p11 }
  0x7a   : > { %p1341_p3 = scmp.ne.s32.totalorder %s1764_s18, 0 }
  0x7b   : > { %1745 = vsyncadd (%p2302_p10), [#allocation7], 4294963200  ;;  %v1782_v0 = vmov (!%p1341_p3), 0.0  }
  0x7c   : > { %337 = sbr.rel (%p1341_p3) target bundleno = 140 (0x8c), region = 52  ;;  %338 = vst [vmem:[#allocation2] sm:$0xff] (!%p1341_p3), %v1782_v0  ;;  %339 = vst [vmem:[#allocation2 + $0x8] sm:$0xff] (!%p1341_p3), %v1782_v0 }
  0x7d   : > { %340 = vst [vmem:[#allocation2 + $0x10] sm:$0xff] (!%p1341_p3), %v1782_v0  ;;  %341 = vst [vmem:[#allocation2 + $0x18] sm:$0xff] (!%p1341_p3), %v1782_v0 }
  0x7e   : > { %342 = vst [vmem:[#allocation2 + $0x20] sm:$0xff] (!%p1341_p3), %v1782_v0  ;;  %343 = vst [vmem:[#allocation2 + $0x28] sm:$0xff] (!%p1341_p3), %v1782_v0 }
  0x7f   : > { %344 = vst [vmem:[#allocation2 + $0x30] sm:$0xff] (!%p1341_p3), %v1782_v0  ;;  %345 = vst [vmem:[#allocation2 + $0x38] sm:$0xff] (!%p1341_p3), %v1782_v0 }
  0x80   : > { %346 = vst [vmem:[#allocation2 + $0x40] sm:$0xff] (!%p1341_p3), %v1782_v0  ;;  %347 = vst [vmem:[#allocation2 + $0x48] sm:$0xff] (!%p1341_p3), %v1782_v0 }
  0x81   : > { %348 = vst [vmem:[#allocation2 + $0x50] sm:$0xff] (!%p1341_p3), %v1782_v0  ;;  %349 = vst [vmem:[#allocation2 + $0x58] sm:$0xff] (!%p1341_p3), %v1782_v0 }
  0x82   : > { %350 = vst [vmem:[#allocation2 + $0x60] sm:$0xff] (!%p1341_p3), %v1782_v0  ;;  %351 = vst [vmem:[#allocation2 + $0x68] sm:$0xff] (!%p1341_p3), %v1782_v0 }
  0x83   : > { %352 = vst [vmem:[#allocation2 + $0x70] sm:$0xff] %v1782_v0  ;;  %353 = vst [vmem:[#allocation2 + $0x78] sm:$0xff] %v1782_v0 }
  0x84   : > { %354 = vst [vmem:[#allocation2 + $0x80] sm:$0xff] %v1782_v0  ;;  %355 = vst [vmem:[#allocation2 + $0x88] sm:$0xff] %v1782_v0 }
  0x85   : > { %356 = vst [vmem:[#allocation2 + $0x90] sm:$0xff] %v1782_v0  ;;  %357 = vst [vmem:[#allocation2 + $0x98] sm:$0xff] %v1782_v0 }
  0x86   : > { %358 = vst [vmem:[#allocation2 + $0xa0] sm:$0xff] %v1782_v0  ;;  %359 = vst [vmem:[#allocation2 + $0xa8] sm:$0xff] %v1782_v0 }
  0x87   : > { %360 = vst [vmem:[#allocation2 + $0xb0] sm:$0xff] %v1782_v0  ;;  %361 = vst [vmem:[#allocation2 + $0xb8] sm:$0xff] %v1782_v0 }
  0x88   : > { %362 = vst [vmem:[#allocation2 + $0xc0] sm:$0xff] %v1782_v0  ;;  %363 = vst [vmem:[#allocation2 + $0xc8] sm:$0xff] %v1782_v0 }
  0x89   : > { %364 = vst [vmem:[#allocation2 + $0xd0] sm:$0xff] %v1782_v0  ;;  %365 = vst [vmem:[#allocation2 + $0xd8] sm:$0xff] %v1782_v0 }
  0x8a   : > { %366 = vst [vmem:[#allocation2 + $0xe0] sm:$0xff] %v1782_v0  ;;  %367 = vst [vmem:[#allocation2 + $0xe8] sm:$0xff] %v1782_v0 }
  0x8b   : > { %368 = vst [vmem:[#allocation2 + $0xf0] sm:$0xff] %v1782_v0  ;;  %369 = vst [vmem:[#allocation2 + $0xf8] sm:$0xff] %v1782_v0 }
  0x8c PF: > { %v467_v1 = vld [vmem:[%s1993_s13 + $0x8] sm:$0xff]  ;;  %v469_v2 = vld [vmem:[%s1993_s13 + $0x18] sm:$0xff]  ;;  %v466_v6 = vld [vmem:[%s1993_s13] sm:$0xff]  ;;  %p1342_p6 = scmp.ne.s32.totalorder %s1764_s18, 1 }
  0x8d   : > { %v531_v3 = vld [vmem:[%s1993_s13 + $0x208] sm:$0xff]  ;;  %v1350_v4 = vpack.c.bf16 %v469_v2, %v467_v1  ;;  %v533_v5 = vld [vmem:[%s1993_s13 + $0x218] sm:$0xff]  ;;  %v468_v7 = vld [vmem:[%s1993_s13 + $0x10] sm:$0xff] }
  0x8e   : > { %v1414_v8 = vpack.c.bf16 %v533_v5, %v531_v3  ;;  %v1352_v9 = vpack.c.bf16 %v468_v7, %v466_v6  ;;  %v530_v10 = vld [vmem:[%s1993_s13 + $0x200] sm:$0xff]  ;;  %v532_v11 = vld [vmem:[%s1993_s13 + $0x210] sm:$0xff]  ;;  %v471_v12 = vld [vmem:[%s1993_s13 + $0x28] sm:$0xff] }
  0x8f   : > { %1351 = vmatprep.subr.bf16.mxu1 %v1350_v4  ;;  %v1416_v13 = vpack.c.bf16 %v532_v11, %v530_v10  ;;  %v473_v14 = vld [vmem:[%s1993_s13 + $0x38] sm:$0xff]  ;;  %v535_v15 = vld [vmem:[%s1993_s13 + $0x228] sm:$0xff]  ;;  %v470_v19 = vld [vmem:[%s1993_s13 + $0x20] sm:$0xff] }
  0x90   : > { %v537_v16 = vld [vmem:[%s1993_s13 + $0x238] sm:$0xff]  ;;  %1415 = vmatprep.subr.bf16.mxu0 %v1414_v8  ;;  %1353 = vmatpush1.bf16.msra.mxu1 %v1352_v9  ;;  %v1354_v17 = vpack.c.bf16 %v473_v14, %v471_v12  ;;  %v472_v20 = vld [vmem:[%s1993_s13 + $0x30] sm:$0xff]  ;;  %v534_v21 = vld [vmem:[%s1993_s13 + $0x220] sm:$0xff] }
  0x91   : > { %v1418_v18 = vpack.c.bf16 %v537_v16, %v535_v15  ;;  %1417 = vmatpush1.bf16.msra.mxu0 %v1416_v13  ;;  %v1356_v22 = vpack.c.bf16 %v472_v20, %v470_v19  ;;  %v536_v23 = vld [vmem:[%s1993_s13 + $0x230] sm:$0xff]  ;;  %v475_v24 = vld [vmem:[%s1993_s13 + $0x48] sm:$0xff]  ;;  %v477_v25 = vld [vmem:[%s1993_s13 + $0x58] sm:$0xff] }
  0x92   : > { %1355 = vmatprep.subr.bf16.mxu1 %v1354_v17  ;;  %v1420_v26 = vpack.c.bf16 %v536_v23, %v534_v21  ;;  %v1358_v27 = vpack.c.bf16 %v477_v25, %v475_v24  ;;  %v539_v28 = vld [vmem:[%s1993_s13 + $0x248] sm:$0xff]  ;;  %v541_v29 = vld [vmem:[%s1993_s13 + $0x258] sm:$0xff]  ;;  %v474_v30 = vld [vmem:[%s1993_s13 + $0x40] sm:$0xff] }
  0x93   : > { %1419 = vmatprep.subr.bf16.mxu0 %v1418_v18  ;;  %v1422_v31 = vpack.c.bf16 %v541_v29, %v539_v28  ;;  %v476_v32 = vld [vmem:[%s1993_s13 + $0x50] sm:$0xff]  ;;  %v538_v33 = vld [vmem:[%s1993_s13 + $0x240] sm:$0xff]  ;;  %v479_v36 = vld [vmem:[%s1993_s13 + $0x68] sm:$0xff] }
  0x94   : > { %v540_v34 = vld [vmem:[%s1993_s13 + $0x250] sm:$0xff]  ;;  %1357 = vmatpush1.bf16.msra.mxu1 %v1356_v22  ;;  %v1360_v35 = vpack.c.bf16 %v476_v32, %v474_v30  ;;  %v481_v37 = vld [vmem:[%s1993_s13 + $0x78] sm:$0xff]  ;;  %v543_v38 = vld [vmem:[%s1993_s13 + $0x268] sm:$0xff] }
  0x95   : > { %1421 = vmatpush1.bf16.msra.mxu0 %v1420_v26  ;;  %1359 = vmatprep.subr.bf16.mxu1 %v1358_v27  ;;  %v1424_v39 = vpack.c.bf16 %v540_v34, %v538_v33  ;;  %v1362_v40 = vpack.c.bf16 %v481_v37, %v479_v36  ;;  %v545_v41 = vld [vmem:[%s1993_s13 + $0x278] sm:$0xff]  ;;  %v478_v42 = vld [vmem:[%s1993_s13 + $0x60] sm:$0xff]  ;;  %v480_v43 = vld [vmem:[%s1993_s13 + $0x70] sm:$0xff] }
  0x96   : > { %1423 = vmatprep.subr.bf16.mxu0 %v1422_v31  ;;  %v1426_v44 = vpack.c.bf16 %v545_v41, %v543_v38  ;;  %v542_v45 = vld [vmem:[%s1993_s13 + $0x260] sm:$0xff]  ;;  %v544_v46 = vld [vmem:[%s1993_s13 + $0x270] sm:$0xff]  ;;  %v483_v47 = vld [vmem:[%s1993_s13 + $0x88] sm:$0xff]  ;;  %v1364_v51 = vpack.c.bf16 %v480_v43, %v478_v42 }
  0x97   : > { %v485_v48 = vld [vmem:[%s1993_s13 + $0x98] sm:$0xff]  ;;  %v547_v49 = vld [vmem:[%s1993_s13 + $0x288] sm:$0xff]  ;;  %v1428_v52 = vpack.c.bf16 %v544_v46, %v542_v45  ;;  %v482_v54 = vld [vmem:[%s1993_s13 + $0x80] sm:$0xff] }
  0x98   : > { %v549_v50 = vld [vmem:[%s1993_s13 + $0x298] sm:$0xff]  ;;  %1361 = vmatpush1.bf16.msra.mxu1 %v1360_v35  ;;  %v1366_v53 = vpack.c.bf16 %v485_v48, %v483_v47  ;;  %v484_v55 = vld [vmem:[%s1993_s13 + $0x90] sm:$0xff]  ;;  %v546_v56 = vld [vmem:[%s1993_s13 + $0x280] sm:$0xff] }
  0x99   : > { %1425 = vmatpush1.bf16.msra.mxu0 %v1424_v39  ;;  %1363 = vmatprep.subr.bf16.mxu1 %v1362_v40  ;;  %v1430_v57 = vpack.c.bf16 %v549_v50, %v547_v49  ;;  %v548_v58 = vld [vmem:[%s1993_s13 + $0x290] sm:$0xff]  ;;  %v487_v59 = vld [vmem:[%s1993_s13 + $0xa8] sm:$0xff]  ;;  %v489_v60 = vld [vmem:[%s1993_s13 + $0xb8] sm:$0xff]  ;;  %v1368_v63 = vpack.c.bf16 %v484_v55, %v482_v54 }
  0x9a   : > { %1427 = vmatprep.subr.bf16.mxu0 %v1426_v44  ;;  %v551_v61 = vld [vmem:[%s1993_s13 + $0x2a8] sm:$0xff]  ;;  %v553_v62 = vld [vmem:[%s1993_s13 + $0x2b8] sm:$0xff]  ;;  %v1432_v0 = vpack.c.bf16 %v548_v58, %v546_v56  ;;  %v1370_v1 = vpack.c.bf16 %v489_v60, %v487_v59  ;;  %v486_v2 = vld [vmem:[%s1993_s13 + $0xa0] sm:$0xff] }
  0x9b   : > { %v488_v3 = vld [vmem:[%s1993_s13 + $0xb0] sm:$0xff]  ;;  %v550_v4 = vld [vmem:[%s1993_s13 + $0x2a0] sm:$0xff]  ;;  %v1434_v5 = vpack.c.bf16 %v553_v62, %v551_v61  ;;  %v491_v7 = vld [vmem:[%s1993_s13 + $0xc8] sm:$0xff] }
  0x9c   : > { %1365 = vmatpush1.bf16.msra.mxu1 %v1364_v51  ;;  %v552_v6 = vld [vmem:[%s1993_s13 + $0x2b0] sm:$0xff]  ;;  %v493_v8 = vld [vmem:[%s1993_s13 + $0xd8] sm:$0xff]  ;;  %v555_v9 = vld [vmem:[%s1993_s13 + $0x2c8] sm:$0xff]  ;;  %v1372_v11 = vpack.c.bf16 %v488_v3, %v486_v2 }
  0x9d   : > { %1429 = vmatpush1.bf16.msra.mxu0 %v1428_v52  ;;  %1367 = vmatprep.subr.bf16.mxu1 %v1366_v53  ;;  %v557_v10 = vld [vmem:[%s1993_s13 + $0x2d8] sm:$0xff]  ;;  %v1436_v12 = vpack.c.bf16 %v552_v6, %v550_v4  ;;  %v1374_v13 = vpack.c.bf16 %v493_v8, %v491_v7  ;;  %v490_v14 = vld [vmem:[%s1993_s13 + $0xc0] sm:$0xff]  ;;  %v492_v15 = vld [vmem:[%s1993_s13 + $0xd0] sm:$0xff] }
  0x9e   : > { %1431 = vmatprep.subr.bf16.mxu0 %v1430_v57  ;;  %v554_v16 = vld [vmem:[%s1993_s13 + $0x2c0] sm:$0xff]  ;;  %v1438_v17 = vpack.c.bf16 %v557_v10, %v555_v9  ;;  %v556_v18 = vld [vmem:[%s1993_s13 + $0x2d0] sm:$0xff]  ;;  %v495_v19 = vld [vmem:[%s1993_s13 + $0xe8] sm:$0xff]  ;;  %v1376_v23 = vpack.c.bf16 %v492_v15, %v490_v14 }
  0x9f   : > { %v497_v20 = vld [vmem:[%s1993_s13 + $0xf8] sm:$0xff]  ;;  %v559_v21 = vld [vmem:[%s1993_s13 + $0x2e8] sm:$0xff]  ;;  %v1440_v24 = vpack.c.bf16 %v556_v18, %v554_v16  ;;  %v494_v26 = vld [vmem:[%s1993_s13 + $0xe0] sm:$0xff] }
  0xa0   : > { %1369 = vmatpush1.bf16.msra.mxu1 %v1368_v63  ;;  %v561_v22 = vld [vmem:[%s1993_s13 + $0x2f8] sm:$0xff]  ;;  %v1378_v25 = vpack.c.bf16 %v497_v20, %v495_v19  ;;  %v496_v27 = vld [vmem:[%s1993_s13 + $0xf0] sm:$0xff]  ;;  %v558_v28 = vld [vmem:[%s1993_s13 + $0x2e0] sm:$0xff] }
  0xa1   : > { %1433 = vmatpush1.bf16.msra.mxu0 %v1432_v0  ;;  %1371 = vmatprep.subr.bf16.mxu1 %v1370_v1  ;;  %v1442_v29 = vpack.c.bf16 %v561_v22, %v559_v21  ;;  %v560_v30 = vld [vmem:[%s1993_s13 + $0x2f0] sm:$0xff]  ;;  %v499_v31 = vld [vmem:[%s1993_s13 + $0x108] sm:$0xff]  ;;  %v501_v32 = vld [vmem:[%s1993_s13 + $0x118] sm:$0xff]  ;;  %v1380_v35 = vpack.c.bf16 %v496_v27, %v494_v26 }
  0xa2   : > { %1435 = vmatprep.subr.bf16.mxu0 %v1434_v5  ;;  %v563_v33 = vld [vmem:[%s1993_s13 + $0x308] sm:$0xff]  ;;  %v565_v34 = vld [vmem:[%s1993_s13 + $0x318] sm:$0xff]  ;;  %v1444_v36 = vpack.c.bf16 %v560_v30, %v558_v28  ;;  %v1382_v37 = vpack.c.bf16 %v501_v32, %v499_v31  ;;  %v498_v38 = vld [vmem:[%s1993_s13 + $0x100] sm:$0xff] }
  0xa3   : > { %v500_v39 = vld [vmem:[%s1993_s13 + $0x110] sm:$0xff]  ;;  %v562_v40 = vld [vmem:[%s1993_s13 + $0x300] sm:$0xff]  ;;  %v1446_v41 = vpack.c.bf16 %v565_v34, %v563_v33  ;;  %v503_v43 = vld [vmem:[%s1993_s13 + $0x128] sm:$0xff] }
  0xa4   : > { %1373 = vmatpush1.bf16.msra.mxu1 %v1372_v11  ;;  %v564_v42 = vld [vmem:[%s1993_s13 + $0x310] sm:$0xff]  ;;  %v505_v44 = vld [vmem:[%s1993_s13 + $0x138] sm:$0xff]  ;;  %v567_v45 = vld [vmem:[%s1993_s13 + $0x328] sm:$0xff]  ;;  %v1384_v47 = vpack.c.bf16 %v500_v39, %v498_v38 }
  0xa5   : > { %1437 = vmatpush1.bf16.msra.mxu0 %v1436_v12  ;;  %1375 = vmatprep.subr.bf16.mxu1 %v1374_v13  ;;  %v569_v46 = vld [vmem:[%s1993_s13 + $0x338] sm:$0xff]  ;;  %v1448_v48 = vpack.c.bf16 %v564_v42, %v562_v40  ;;  %v1386_v49 = vpack.c.bf16 %v505_v44, %v503_v43  ;;  %v502_v50 = vld [vmem:[%s1993_s13 + $0x120] sm:$0xff]  ;;  %v504_v51 = vld [vmem:[%s1993_s13 + $0x130] sm:$0xff] }
  0xa6   : > { %1439 = vmatprep.subr.bf16.mxu0 %v1438_v17  ;;  %v566_v52 = vld [vmem:[%s1993_s13 + $0x320] sm:$0xff]  ;;  %v1450_v53 = vpack.c.bf16 %v569_v46, %v567_v45  ;;  %v568_v54 = vld [vmem:[%s1993_s13 + $0x330] sm:$0xff]  ;;  %v507_v55 = vld [vmem:[%s1993_s13 + $0x148] sm:$0xff]  ;;  %v1388_v59 = vpack.c.bf16 %v504_v51, %v502_v50 }
  0xa7   : > { %v509_v56 = vld [vmem:[%s1993_s13 + $0x158] sm:$0xff]  ;;  %v571_v57 = vld [vmem:[%s1993_s13 + $0x348] sm:$0xff]  ;;  %v1452_v60 = vpack.c.bf16 %v568_v54, %v566_v52  ;;  %v506_v62 = vld [vmem:[%s1993_s13 + $0x140] sm:$0xff] }
  0xa8   : > { %1377 = vmatpush1.bf16.msra.mxu1 %v1376_v23  ;;  %v573_v58 = vld [vmem:[%s1993_s13 + $0x358] sm:$0xff]  ;;  %v1390_v61 = vpack.c.bf16 %v509_v56, %v507_v55  ;;  %v508_v63 = vld [vmem:[%s1993_s13 + $0x150] sm:$0xff]  ;;  %v570_v0 = vld [vmem:[%s1993_s13 + $0x340] sm:$0xff] }
  0xa9   : > { %1441 = vmatpush1.bf16.msra.mxu0 %v1440_v24  ;;  %1379 = vmatprep.subr.bf16.mxu1 %v1378_v25  ;;  %v1454_v1 = vpack.c.bf16 %v573_v58, %v571_v57  ;;  %v572_v2 = vld [vmem:[%s1993_s13 + $0x350] sm:$0xff]  ;;  %v511_v3 = vld [vmem:[%s1993_s13 + $0x168] sm:$0xff]  ;;  %v513_v4 = vld [vmem:[%s1993_s13 + $0x178] sm:$0xff]  ;;  %v1392_v7 = vpack.c.bf16 %v508_v63, %v506_v62 }
  0xaa   : > { %1443 = vmatprep.subr.bf16.mxu0 %v1442_v29  ;;  %v575_v5 = vld [vmem:[%s1993_s13 + $0x368] sm:$0xff]  ;;  %v577_v6 = vld [vmem:[%s1993_s13 + $0x378] sm:$0xff]  ;;  %v510_v8 = vld [vmem:[%s1993_s13 + $0x160] sm:$0xff]  ;;  %v1456_v9 = vpack.c.bf16 %v572_v2, %v570_v0  ;;  %v1394_v10 = vpack.c.bf16 %v513_v4, %v511_v3 }
  0xab   : > { %v512_v11 = vld [vmem:[%s1993_s13 + $0x170] sm:$0xff]  ;;  %v574_v12 = vld [vmem:[%s1993_s13 + $0x360] sm:$0xff]  ;;  %v1458_v14 = vpack.c.bf16 %v577_v6, %v575_v5  ;;  %v515_v15 = vld [vmem:[%s1993_s13 + $0x188] sm:$0xff] }
  0xac   : > { %1381 = vmatpush1.bf16.msra.mxu1 %v1380_v35  ;;  %v576_v13 = vld [vmem:[%s1993_s13 + $0x370] sm:$0xff]  ;;  %v517_v16 = vld [vmem:[%s1993_s13 + $0x198] sm:$0xff]  ;;  %v403_v17 = vld [vmem:[%s1986_s25 + $0x8] sm:$0xff]  ;;  %v1396_v21 = vpack.c.bf16 %v512_v11, %v510_v8 }
  0xad   : > { %1445 = vmatpush1.bf16.msra.mxu0 %v1444_v36  ;;  %1383 = vmatprep.subr.bf16.mxu1 %v1382_v37  ;;  %v579_v18 = vld [vmem:[%s1993_s13 + $0x388] sm:$0xff]  ;;  %v581_v19 = vld [vmem:[%s1993_s13 + $0x398] sm:$0xff]  ;;  %v1460_v22 = vpack.c.bf16 %v576_v13, %v574_v12  ;;  %v1398_v23 = vpack.c.bf16 %v517_v16, %v515_v15  ;;  %v514_v24 = vld [vmem:[%s1993_s13 + $0x180] sm:$0xff] }
  0xae   : > { %1447 = vmatprep.subr.bf16.mxu0 %v1446_v41  ;;  %658 = vmatprep.mubr.f32.mxu1 %v403_v17  ;;  %v405_v20 = vld [vmem:[%s1986_s25 + $0x18] sm:$0xff]  ;;  %v516_v25 = vld [vmem:[%s1993_s13 + $0x190] sm:$0xff]  ;;  %v578_v26 = vld [vmem:[%s1993_s13 + $0x380] sm:$0xff]  ;;  %v1462_v27 = vpack.c.bf16 %v581_v19, %v579_v18 }
  0xaf   : > { %819 = vmatprep.mubr.f32.mxu0 %v405_v20  ;;  %v580_v28 = vld [vmem:[%s1993_s13 + $0x390] sm:$0xff]  ;;  %v519_v29 = vld [vmem:[%s1993_s13 + $0x1a8] sm:$0xff]  ;;  %v521_v30 = vld [vmem:[%s1993_s13 + $0x1b8] sm:$0xff]  ;;  %v1400_v33 = vpack.c.bf16 %v516_v25, %v514_v24 }
  0xb0   : > { %1385 = vmatpush1.bf16.msra.mxu1 %v1384_v47  ;;  %v583_v31 = vld [vmem:[%s1993_s13 + $0x3a8] sm:$0xff]  ;;  %v585_v32 = vld [vmem:[%s1993_s13 + $0x3b8] sm:$0xff]  ;;  %v1464_v34 = vpack.c.bf16 %v580_v28, %v578_v26  ;;  %v1402_v35 = vpack.c.bf16 %v521_v30, %v519_v29  ;;  %v518_v36 = vld [vmem:[%s1993_s13 + $0x1a0] sm:$0xff] }
  0xb1   : > { %1449 = vmatpush1.bf16.msra.mxu0 %v1448_v48  ;;  %1387 = vmatprep.subr.bf16.mxu1 %v1386_v49  ;;  %v520_v37 = vld [vmem:[%s1993_s13 + $0x1b0] sm:$0xff]  ;;  %v582_v38 = vld [vmem:[%s1993_s13 + $0x3a0] sm:$0xff]  ;;  %v1466_v39 = vpack.c.bf16 %v585_v32, %v583_v31  ;;  %v523_v41 = vld [vmem:[%s1993_s13 + $0x1c8] sm:$0xff] }
  0xb2   : > { %1451 = vmatprep.subr.bf16.mxu0 %v1450_v53  ;;  %v584_v40 = vld [vmem:[%s1993_s13 + $0x3b0] sm:$0xff]  ;;  %v525_v42 = vld [vmem:[%s1993_s13 + $0x1d8] sm:$0xff]  ;;  %v587_v43 = vld [vmem:[%s1993_s13 + $0x3c8] sm:$0xff]  ;;  %v1404_v45 = vpack.c.bf16 %v520_v37, %v518_v36 }
  0xb3   : > { %v589_v44 = vld [vmem:[%s1993_s13 + $0x3d8] sm:$0xff]  ;;  %v1468_v46 = vpack.c.bf16 %v584_v40, %v582_v38  ;;  %v1406_v47 = vpack.c.bf16 %v525_v42, %v523_v41  ;;  %v522_v48 = vld [vmem:[%s1993_s13 + $0x1c0] sm:$0xff]  ;;  %v524_v49 = vld [vmem:[%s1993_s13 + $0x1d0] sm:$0xff] }
  0xb4   : > { %1389 = vmatpush1.bf16.msra.mxu1 %v1388_v59  ;;  %v586_v50 = vld [vmem:[%s1993_s13 + $0x3c0] sm:$0xff]  ;;  %v1470_v51 = vpack.c.bf16 %v589_v44, %v587_v43  ;;  %v588_v52 = vld [vmem:[%s1993_s13 + $0x3d0] sm:$0xff]  ;;  %v527_v53 = vld [vmem:[%s1993_s13 + $0x1e8] sm:$0xff]  ;;  %v1408_v57 = vpack.c.bf16 %v524_v49, %v522_v48 }
  0xb5   : > { %1453 = vmatpush1.bf16.msra.mxu0 %v1452_v60  ;;  %1391 = vmatprep.subr.bf16.mxu1 %v1390_v61  ;;  %v529_v54 = vld [vmem:[%s1993_s13 + $0x1f8] sm:$0xff]  ;;  %v591_v55 = vld [vmem:[%s1993_s13 + $0x3e8] sm:$0xff]  ;;  %v1472_v58 = vpack.c.bf16 %v588_v52, %v586_v50  ;;  %v526_v60 = vld [vmem:[%s1993_s13 + $0x1e0] sm:$0xff] }
  0xb6   : > { %1455 = vmatprep.subr.bf16.mxu0 %v1454_v1  ;;  %v593_v56 = vld [vmem:[%s1993_s13 + $0x3f8] sm:$0xff]  ;;  %v1410_v59 = vpack.c.bf16 %v529_v54, %v527_v53  ;;  %v528_v61 = vld [vmem:[%s1993_s13 + $0x1f0] sm:$0xff]  ;;  %v590_v63 = vld [vmem:[%s1993_s13 + $0x3e0] sm:$0xff] }
  0xb7   : > { %v1474_v62 = vpack.c.bf16 %v593_v56, %v591_v55  ;;  %v592_v0 = vld [vmem:[%s1993_s13 + $0x3f0] sm:$0xff]  ;;  %v1412_v1 = vpack.c.bf16 %v528_v61, %v526_v60  ;;  %v402_v3 = vld [vmem:[%s1986_s25] sm:$0xff]  ;;  %v407_v5 = vld [vmem:[%s1986_s25 + $0x28] sm:$0xff] }
  0xb8   : > { %1393 = vmatpush1.bf16.msra.mxu1 %v1392_v7  ;;  %v1476_v2 = vpack.c.bf16 %v592_v0, %v590_v63  ;;  %v404_v4 = vld [vmem:[%s1986_s25 + $0x10] sm:$0xff]  ;;  %v409_v6 = vld [vmem:[%s1986_s25 + $0x38] sm:$0xff]  ;;  %v406_v7 = vld [vmem:[%s1986_s25 + $0x20] sm:$0xff] }
  0xb9   : > { %1457 = vmatpush1.bf16.msra.mxu0 %v1456_v9  ;;  %1395 = vmatprep.subr.bf16.mxu1 %v1394_v10  ;;  %v408_v8 = vld [vmem:[%s1986_s25 + $0x30] sm:$0xff]  ;;  %v411_v9 = vld [vmem:[%s1986_s25 + $0x48] sm:$0xff]  ;;  %v413_v10 = vld [vmem:[%s1986_s25 + $0x58] sm:$0xff] }
  0xba   : > { %1459 = vmatprep.subr.bf16.mxu0 %v1458_v14  ;;  %v410_v11 = vld [vmem:[%s1986_s25 + $0x40] sm:$0xff]  ;;  %v412_v12 = vld [vmem:[%s1986_s25 + $0x50] sm:$0xff]  ;;  %v415_v13 = vld [vmem:[%s1986_s25 + $0x68] sm:$0xff] }
  0xbb   : > { %v417_v14 = vld [vmem:[%s1986_s25 + $0x78] sm:$0xff]  ;;  %v414_v15 = vld [vmem:[%s1986_s25 + $0x60] sm:$0xff]  ;;  %v416_v16 = vld [vmem:[%s1986_s25 + $0x70] sm:$0xff] }
  0xbc   : > { %1397 = vmatpush1.bf16.msra.mxu1 %v1396_v21  ;;  %v419_v17 = vld [vmem:[%s1986_s25 + $0x88] sm:$0xff]  ;;  %v421_v18 = vld [vmem:[%s1986_s25 + $0x98] sm:$0xff]  ;;  %v418_v19 = vld [vmem:[%s1986_s25 + $0x80] sm:$0xff] }
  0xbd   : > { %1461 = vmatpush1.bf16.msra.mxu0 %v1460_v22  ;;  %1399 = vmatprep.subr.bf16.mxu1 %v1398_v23  ;;  %v420_v20 = vld [vmem:[%s1986_s25 + $0x90] sm:$0xff]  ;;  %v423_v21 = vld [vmem:[%s1986_s25 + $0xa8] sm:$0xff]  ;;  %v425_v22 = vld [vmem:[%s1986_s25 + $0xb8] sm:$0xff] }
  0xbe   : > { %1463 = vmatprep.subr.bf16.mxu0 %v1462_v27  ;;  %v422_v23 = vld [vmem:[%s1986_s25 + $0xa0] sm:$0xff]  ;;  %v424_v24 = vld [vmem:[%s1986_s25 + $0xb0] sm:$0xff]  ;;  %v427_v25 = vld [vmem:[%s1986_s25 + $0xc8] sm:$0xff] }
  0xbf   : > { %v429_v26 = vld [vmem:[%s1986_s25 + $0xd8] sm:$0xff]  ;;  %v426_v27 = vld [vmem:[%s1986_s25 + $0xc0] sm:$0xff]  ;;  %v428_v28 = vld [vmem:[%s1986_s25 + $0xd0] sm:$0xff] }
  0xc0   : > { %1401 = vmatpush1.bf16.msra.mxu1 %v1400_v33  ;;  %v431_v29 = vld [vmem:[%s1986_s25 + $0xe8] sm:$0xff]  ;;  %v433_v30 = vld [vmem:[%s1986_s25 + $0xf8] sm:$0xff]  ;;  %v430_v31 = vld [vmem:[%s1986_s25 + $0xe0] sm:$0xff] }
  0xc1   : > { %1465 = vmatpush1.bf16.msra.mxu0 %v1464_v34  ;;  %1403 = vmatprep.subr.bf16.mxu1 %v1402_v35  ;;  %v432_v32 = vld [vmem:[%s1986_s25 + $0xf0] sm:$0xff]  ;;  %v435_v33 = vld [vmem:[%s1986_s25 + $0x108] sm:$0xff]  ;;  %v437_v34 = vld [vmem:[%s1986_s25 + $0x118] sm:$0xff] }
  0xc2   : > { %1467 = vmatprep.subr.bf16.mxu0 %v1466_v39  ;;  %v434_v35 = vld [vmem:[%s1986_s25 + $0x100] sm:$0xff]  ;;  %v436_v36 = vld [vmem:[%s1986_s25 + $0x110] sm:$0xff]  ;;  %v439_v37 = vld [vmem:[%s1986_s25 + $0x128] sm:$0xff] }
  0xc3   : > { %v441_v38 = vld [vmem:[%s1986_s25 + $0x138] sm:$0xff]  ;;  %v438_v39 = vld [vmem:[%s1986_s25 + $0x120] sm:$0xff]  ;;  %v440_v40 = vld [vmem:[%s1986_s25 + $0x130] sm:$0xff] }
  0xc4   : > { %1405 = vmatpush1.bf16.msra.mxu1 %v1404_v45  ;;  %v443_v41 = vld [vmem:[%s1986_s25 + $0x148] sm:$0xff]  ;;  %v445_v42 = vld [vmem:[%s1986_s25 + $0x158] sm:$0xff]  ;;  %v442_v43 = vld [vmem:[%s1986_s25 + $0x140] sm:$0xff] }
  0xc5   : > { %1469 = vmatpush1.bf16.msra.mxu0 %v1468_v46  ;;  %1407 = vmatprep.subr.bf16.mxu1 %v1406_v47  ;;  %v444_v44 = vld [vmem:[%s1986_s25 + $0x150] sm:$0xff]  ;;  %v447_v45 = vld [vmem:[%s1986_s25 + $0x168] sm:$0xff]  ;;  %v449_v46 = vld [vmem:[%s1986_s25 + $0x178] sm:$0xff] }
  0xc6   : > { %1471 = vmatprep.subr.bf16.mxu0 %v1470_v51  ;;  %v446_v47 = vld [vmem:[%s1986_s25 + $0x160] sm:$0xff]  ;;  %v448_v48 = vld [vmem:[%s1986_s25 + $0x170] sm:$0xff]  ;;  %v451_v49 = vld [vmem:[%s1986_s25 + $0x188] sm:$0xff] }
  0xc7   : > { %v453_v50 = vld [vmem:[%s1986_s25 + $0x198] sm:$0xff]  ;;  %v450_v51 = vld [vmem:[%s1986_s25 + $0x180] sm:$0xff]  ;;  %v452_v52 = vld [vmem:[%s1986_s25 + $0x190] sm:$0xff] }
  0xc8   : > { %1409 = vmatpush1.bf16.msra.mxu1 %v1408_v57  ;;  %v455_v53 = vld [vmem:[%s1986_s25 + $0x1a8] sm:$0xff]  ;;  %v457_v54 = vld [vmem:[%s1986_s25 + $0x1b8] sm:$0xff]  ;;  %v454_v55 = vld [vmem:[%s1986_s25 + $0x1a0] sm:$0xff] }
  0xc9   : > { %1473 = vmatpush1.bf16.msra.mxu0 %v1472_v58  ;;  %1411 = vmatprep.subr.bf16.mxu1 %v1410_v59  ;;  %v456_v56 = vld [vmem:[%s1986_s25 + $0x1b0] sm:$0xff]  ;;  %v459_v57 = vld [vmem:[%s1986_s25 + $0x1c8] sm:$0xff]  ;;  %v461_v58 = vld [vmem:[%s1986_s25 + $0x1d8] sm:$0xff] }
  0xca   : > { %1475 = vmatprep.subr.bf16.mxu0 %v1474_v62  ;;  %v458_v59 = vld [vmem:[%s1986_s25 + $0x1c0] sm:$0xff]  ;;  %v460_v60 = vld [vmem:[%s1986_s25 + $0x1d0] sm:$0xff]  ;;  %v463_v61 = vld [vmem:[%s1986_s25 + $0x1e8] sm:$0xff] }
  0xcb   : > { %v465_v62 = vld [vmem:[%s1986_s25 + $0x1f8] sm:$0xff]  ;;  %v462_v63 = vld [vmem:[%s1986_s25 + $0x1e0] sm:$0xff]  ;;  %v464_v0 = vld [vmem:[%s1986_s25 + $0x1f0] sm:$0xff] }
  0xcc   : > { %1413 = vmatpush1.bf16.msra.mxu1 %v1412_v1 }
  0xcd   : > { %1477 = vmatpush1.bf16.msra.mxu0 %v1476_v2  ;;  %v370_v2 = vld [vmem:[#allocation2] sm:$0xff] }
  0xcf   : > { %659 = vmatmul.mubr.f32.vlgmr.msra.gmra.mrb[0].mxu1 %v402_v3 }
  0xd0   : > { %820 = vmatmul.mubr.f32.vlgmr.msra.gmra.mrb[0].mxu0 %v404_v4  ;;  %664 = vmatprep.mubr.f32.mxu1 %v407_v5 }
  0xd1   : > { %825 = vmatprep.mubr.f32.mxu0 %v409_v6  ;;  %v371_v6 = vld [vmem:[#allocation2 + $0x8] sm:$0xff] }
  0xd3   : > { %665 = vmatmul.mubr.f32.gmra.mrb[2].mxu1 %v406_v7 }
  0xd4   : > { %826 = vmatmul.mubr.f32.gmra.mrb[2].mxu0 %v408_v8  ;;  %670 = vmatprep.mubr.f32.mxu1 %v411_v9 }
  0xd5   : > { %831 = vmatprep.mubr.f32.mxu0 %v413_v10 }
  0xd7   : > { %671 = vmatmul.mubr.f32.gmra.mrb[4].mxu1 %v410_v11 }
  0xd8   : > { %832 = vmatmul.mubr.f32.gmra.mrb[4].mxu0 %v412_v12  ;;  %676 = vmatprep.mubr.f32.mxu1 %v415_v13  ;;  %v372_v12 = vld [vmem:[#allocation2 + $0x10] sm:$0xff] }
  0xd9   : > { %837 = vmatprep.mubr.f32.mxu0 %v417_v14 }
  0xdb   : > { %677 = vmatmul.mubr.f32.gmra.mrb[6].mxu1 %v414_v15 }
  0xdc   : > { %838 = vmatmul.mubr.f32.gmra.mrb[6].mxu0 %v416_v16  ;;  %682 = vmatprep.mubr.f32.mxu1 %v419_v17  ;;  %v373_v16 = vld [vmem:[#allocation2 + $0x18] sm:$0xff] }
  0xdd   : > { %843 = vmatprep.mubr.f32.mxu0 %v421_v18 }
  0xdf   : > { %683 = vmatmul.mubr.f32.gmra.mrb[8].mxu1 %v418_v19 }
  0xe0   : > { %844 = vmatmul.mubr.f32.gmra.mrb[8].mxu0 %v420_v20  ;;  %688 = vmatprep.mubr.f32.mxu1 %v423_v21 }
  0xe1   : > { %849 = vmatprep.mubr.f32.mxu0 %v425_v22  ;;  %v374_v22 = vld [vmem:[#allocation2 + $0x20] sm:$0xff] }
  0xe3   : > { %689 = vmatmul.mubr.f32.gmra.mrb[10].mxu1 %v422_v23 }
  0xe4   : > { %850 = vmatmul.mubr.f32.gmra.mrb[10].mxu0 %v424_v24  ;;  %694 = vmatprep.mubr.f32.mxu1 %v427_v25 }
  0xe5   : > { %855 = vmatprep.mubr.f32.mxu0 %v429_v26  ;;  %v375_v26 = vld [vmem:[#allocation2 + $0x28] sm:$0xff] }
  0xe7   : > { %695 = vmatmul.mubr.f32.gmra.mrb[12].mxu1 %v426_v27 }
  0xe8   : > { %856 = vmatmul.mubr.f32.gmra.mrb[12].mxu0 %v428_v28  ;;  %700 = vmatprep.mubr.f32.mxu1 %v431_v29 }
  0xe9   : > { %861 = vmatprep.mubr.f32.mxu0 %v433_v30 }
  0xeb   : > { %701 = vmatmul.mubr.f32.gmra.mrb[14].mxu1 %v430_v31 }
  0xec   : > { %862 = vmatmul.mubr.f32.gmra.mrb[14].mxu0 %v432_v32  ;;  %706 = vmatprep.mubr.f32.mxu1 %v435_v33  ;;  %v376_v32 = vld [vmem:[#allocation2 + $0x30] sm:$0xff] }
  0xed   : > { %867 = vmatprep.mubr.f32.mxu0 %v437_v34 }
  0xef   : > { %707 = vmatmul.mubr.f32.gmra.mrb[16].mxu1 %v434_v35 }
  0xf0   : > { %868 = vmatmul.mubr.f32.gmra.mrb[16].mxu0 %v436_v36  ;;  %712 = vmatprep.mubr.f32.mxu1 %v439_v37  ;;  %v377_v36 = vld [vmem:[#allocation2 + $0x38] sm:$0xff] }
  0xf1   : > { %873 = vmatprep.mubr.f32.mxu0 %v441_v38 }
  0xf3   : > { %713 = vmatmul.mubr.f32.gmra.mrb[18].mxu1 %v438_v39 }
  0xf4   : > { %874 = vmatmul.mubr.f32.gmra.mrb[18].mxu0 %v440_v40  ;;  %718 = vmatprep.mubr.f32.mxu1 %v443_v41 }
  0xf5   : > { %879 = vmatprep.mubr.f32.mxu0 %v445_v42  ;;  %v378_v42 = vld [vmem:[#allocation2 + $0x40] sm:$0xff] }
  0xf7   : > { %719 = vmatmul.mubr.f32.gmra.mrb[20].mxu1 %v442_v43 }
  0xf8   : > { %880 = vmatmul.mubr.f32.gmra.mrb[20].mxu0 %v444_v44  ;;  %724 = vmatprep.mubr.f32.mxu1 %v447_v45 }
  0xf9   : > { %885 = vmatprep.mubr.f32.mxu0 %v449_v46  ;;  %v379_v46 = vld [vmem:[#allocation2 + $0x48] sm:$0xff] }
  0xfb   : > { %725 = vmatmul.mubr.f32.gmra.mrb[22].mxu1 %v446_v47 }
  0xfc   : > { %886 = vmatmul.mubr.f32.gmra.mrb[22].mxu0 %v448_v48  ;;  %730 = vmatprep.mubr.f32.mxu1 %v451_v49 }
  0xfd   : > { %891 = vmatprep.mubr.f32.mxu0 %v453_v50 }
  0xff   : > { %731 = vmatmul.mubr.f32.gmra.mrb[24].mxu1 %v450_v51 }
 0x100   : > { %892 = vmatmul.mubr.f32.gmra.mrb[24].mxu0 %v452_v52  ;;  %736 = vmatprep.mubr.f32.mxu1 %v455_v53  ;;  %v380_v52 = vld [vmem:[#allocation2 + $0x50] sm:$0xff] }
 0x101   : > { %897 = vmatprep.mubr.f32.mxu0 %v457_v54 }
 0x103   : > { %737 = vmatmul.mubr.f32.gmra.mrb[26].mxu1 %v454_v55 }
 0x104   : > { %898 = vmatmul.mubr.f32.gmra.mrb[26].mxu0 %v456_v56  ;;  %742 = vmatprep.mubr.f32.mxu1 %v459_v57  ;;  %v381_v56 = vld [vmem:[#allocation2 + $0x58] sm:$0xff] }
 0x105   : > { %903 = vmatprep.mubr.f32.mxu0 %v461_v58 }
 0x107   : > { %743 = vmatmul.mubr.f32.gmra.mrb[28].mxu1 %v458_v59 }
 0x108   : > { %904 = vmatmul.mubr.f32.gmra.mrb[28].mxu0 %v460_v60  ;;  %748 = vmatprep.mubr.f32.mxu1 %v463_v61 }
 0x109   : > { %909 = vmatprep.mubr.f32.mxu0 %v465_v62  ;;  %v382_v62 = vld [vmem:[#allocation2 + $0x60] sm:$0xff] }
 0x10b   : > { %749 = vmatmul.mubr.f32.gmra.mrb[30].mxu1 %v462_v63 }
 0x10c   : > { %910 = vmatmul.mubr.f32.gmra.mrb[30].mxu0 %v464_v0 }
 0x1a2   : > { %v660_v1 = vpop.f32.mrb[0].mxu1 }
 0x1a3   : > { %v821_v3 = vpop.f32.mrb[0].mxu0  ;;  %v662_v4 = vpop.f32.mrb[1].mxu1 }
 0x1a4   : > { %v822_v5 = vadd.f32 %v821_v3, %v660_v1  ;;  %v823_v7 = vpop.f32.mrb[1].mxu0 }
 0x1a5   : > { %v824_v8 = vadd.f32 %v823_v7, %v662_v4 }
 0x1a6   : > { %v916_v9 = vadd.f32 %v822_v5, %v370_v2  ;;  %v666_v10 = vpop.f32.mrb[2].mxu1  ;;  %v383_v2 = vld [vmem:[#allocation2 + $0x68] sm:$0xff] }
 0x1a7   : > { %v917_v11 = vadd.f32 %v824_v8, %v371_v6  ;;  %v827_v13 = vpop.f32.mrb[2].mxu0  ;;  %v668_v14 = vpop.f32.mrb[3].mxu1  ;;  %v384_v8 = vld [vmem:[#allocation2 + $0x70] sm:$0xff] }
 0x1a8   : > { %948 = vst [vmem:[#allocation2] sm:$0xff] %v916_v9  ;;  %v828_v15 = vadd.f32 %v827_v13, %v666_v10  ;;  %v829_v17 = vpop.f32.mrb[3].mxu0 }
 0x1a9   : > { %949 = vst [vmem:[#allocation2 + $0x8] sm:$0xff] %v917_v11  ;;  %v830_v18 = vadd.f32 %v829_v17, %v668_v14 }
 0x1aa   : > { %v918_v19 = vadd.f32 %v828_v15, %v372_v12  ;;  %v672_v20 = vpop.f32.mrb[4].mxu1  ;;  %v385_v12 = vld [vmem:[#allocation2 + $0x78] sm:$0xff] }
 0x1ab   : > { %v919_v21 = vadd.f32 %v830_v18, %v373_v16  ;;  %v833_v23 = vpop.f32.mrb[4].mxu0  ;;  %v674_v24 = vpop.f32.mrb[5].mxu1  ;;  %v386_v18 = vld [vmem:[#allocation2 + $0x80] sm:$0xff] }
 0x1ac   : > { %950 = vst [vmem:[#allocation2 + $0x10] sm:$0xff] %v918_v19  ;;  %v834_v25 = vadd.f32 %v833_v23, %v672_v20  ;;  %v835_v27 = vpop.f32.mrb[5].mxu0 }
 0x1ad   : > { %951 = vst [vmem:[#allocation2 + $0x18] sm:$0xff] %v919_v21  ;;  %v836_v28 = vadd.f32 %v835_v27, %v674_v24 }
 0x1ae   : > { %v920_v29 = vadd.f32 %v834_v25, %v374_v22  ;;  %v678_v30 = vpop.f32.mrb[6].mxu1  ;;  %v387_v22 = vld [vmem:[#allocation2 + $0x88] sm:$0xff] }
 0x1af   : > { %v921_v31 = vadd.f32 %v836_v28, %v375_v26  ;;  %v839_v33 = vpop.f32.mrb[6].mxu0  ;;  %v680_v34 = vpop.f32.mrb[7].mxu1  ;;  %v388_v28 = vld [vmem:[#allocation2 + $0x90] sm:$0xff] }
 0x1b0   : > { %952 = vst [vmem:[#allocation2 + $0x20] sm:$0xff] %v920_v29  ;;  %v840_v35 = vadd.f32 %v839_v33, %v678_v30  ;;  %v841_v37 = vpop.f32.mrb[7].mxu0 }
 0x1b1   : > { %953 = vst [vmem:[#allocation2 + $0x28] sm:$0xff] %v921_v31  ;;  %v842_v38 = vadd.f32 %v841_v37, %v680_v34 }
 0x1b2   : > { %v922_v39 = vadd.f32 %v840_v35, %v376_v32  ;;  %v684_v40 = vpop.f32.mrb[8].mxu1  ;;  %v389_v32 = vld [vmem:[#allocation2 + $0x98] sm:$0xff] }
 0x1b3   : > { %v923_v41 = vadd.f32 %v842_v38, %v377_v36  ;;  %v845_v43 = vpop.f32.mrb[8].mxu0  ;;  %v686_v44 = vpop.f32.mrb[9].mxu1  ;;  %v390_v38 = vld [vmem:[#allocation2 + $0xa0] sm:$0xff] }
 0x1b4   : > { %954 = vst [vmem:[#allocation2 + $0x30] sm:$0xff] %v922_v39  ;;  %v846_v45 = vadd.f32 %v845_v43, %v684_v40  ;;  %v847_v47 = vpop.f32.mrb[9].mxu0 }
 0x1b5   : > { %955 = vst [vmem:[#allocation2 + $0x38] sm:$0xff] %v923_v41  ;;  %v848_v48 = vadd.f32 %v847_v47, %v686_v44 }
 0x1b6   : > { %v924_v49 = vadd.f32 %v846_v45, %v378_v42  ;;  %v690_v50 = vpop.f32.mrb[10].mxu1  ;;  %v391_v42 = vld [vmem:[#allocation2 + $0xa8] sm:$0xff] }
 0x1b7   : > { %v925_v51 = vadd.f32 %v848_v48, %v379_v46  ;;  %v851_v53 = vpop.f32.mrb[10].mxu0  ;;  %v692_v54 = vpop.f32.mrb[11].mxu1  ;;  %v392_v48 = vld [vmem:[#allocation2 + $0xb0] sm:$0xff] }
 0x1b8   : > { %956 = vst [vmem:[#allocation2 + $0x40] sm:$0xff] %v924_v49  ;;  %v852_v55 = vadd.f32 %v851_v53, %v690_v50  ;;  %v853_v57 = vpop.f32.mrb[11].mxu0 }
 0x1b9   : > { %957 = vst [vmem:[#allocation2 + $0x48] sm:$0xff] %v925_v51  ;;  %v854_v58 = vadd.f32 %v853_v57, %v692_v54 }
 0x1ba   : > { %v926_v59 = vadd.f32 %v852_v55, %v380_v52  ;;  %v696_v60 = vpop.f32.mrb[12].mxu1  ;;  %v393_v52 = vld [vmem:[#allocation2 + $0xb8] sm:$0xff] }
 0x1bb   : > { %v927_v61 = vadd.f32 %v854_v58, %v381_v56  ;;  %v857_v63 = vpop.f32.mrb[12].mxu0  ;;  %v698_v0 = vpop.f32.mrb[13].mxu1  ;;  %v394_v58 = vld [vmem:[#allocation2 + $0xc0] sm:$0xff] }
 0x1bc   : > { %958 = vst [vmem:[#allocation2 + $0x50] sm:$0xff] %v926_v59  ;;  %v858_v1 = vadd.f32 %v857_v63, %v696_v60  ;;  %v859_v3 = vpop.f32.mrb[13].mxu0 }
 0x1bd   : > { %959 = vst [vmem:[#allocation2 + $0x58] sm:$0xff] %v927_v61  ;;  %v860_v4 = vadd.f32 %v859_v3, %v698_v0 }
 0x1be   : > { %v928_v5 = vadd.f32 %v858_v1, %v382_v62  ;;  %v702_v6 = vpop.f32.mrb[14].mxu1  ;;  %v395_v62 = vld [vmem:[#allocation2 + $0xc8] sm:$0xff] }
 0x1bf   : > { %v929_v7 = vadd.f32 %v860_v4, %v383_v2  ;;  %v863_v9 = vpop.f32.mrb[14].mxu0  ;;  %v704_v10 = vpop.f32.mrb[15].mxu1  ;;  %v396_v4 = vld [vmem:[#allocation2 + $0xd0] sm:$0xff] }
 0x1c0   : > { %960 = vst [vmem:[#allocation2 + $0x60] sm:$0xff] %v928_v5  ;;  %v864_v11 = vadd.f32 %v863_v9, %v702_v6  ;;  %v865_v13 = vpop.f32.mrb[15].mxu0 }
 0x1c1   : > { %961 = vst [vmem:[#allocation2 + $0x68] sm:$0xff] %v929_v7  ;;  %v866_v14 = vadd.f32 %v865_v13, %v704_v10 }
 0x1c2   : > { %v930_v15 = vadd.f32 %v864_v11, %v384_v8  ;;  %v708_v16 = vpop.f32.mrb[16].mxu1  ;;  %v397_v8 = vld [vmem:[#allocation2 + $0xd8] sm:$0xff] }
 0x1c3   : > { %v931_v17 = vadd.f32 %v866_v14, %v385_v12  ;;  %v869_v19 = vpop.f32.mrb[16].mxu0  ;;  %v710_v20 = vpop.f32.mrb[17].mxu1  ;;  %v398_v14 = vld [vmem:[#allocation2 + $0xe0] sm:$0xff] }
 0x1c4   : > { %962 = vst [vmem:[#allocation2 + $0x70] sm:$0xff] %v930_v15  ;;  %v870_v21 = vadd.f32 %v869_v19, %v708_v16  ;;  %v871_v23 = vpop.f32.mrb[17].mxu0 }
 0x1c5   : > { %963 = vst [vmem:[#allocation2 + $0x78] sm:$0xff] %v931_v17  ;;  %v872_v24 = vadd.f32 %v871_v23, %v710_v20 }
 0x1c6   : > { %v932_v25 = vadd.f32 %v870_v21, %v386_v18  ;;  %v714_v26 = vpop.f32.mrb[18].mxu1  ;;  %v399_v18 = vld [vmem:[#allocation2 + $0xe8] sm:$0xff] }
 0x1c7   : > { %v933_v27 = vadd.f32 %v872_v24, %v387_v22  ;;  %v875_v29 = vpop.f32.mrb[18].mxu0  ;;  %v716_v30 = vpop.f32.mrb[19].mxu1  ;;  %v400_v24 = vld [vmem:[#allocation2 + $0xf0] sm:$0xff] }
 0x1c8   : > { %964 = vst [vmem:[#allocation2 + $0x80] sm:$0xff] %v932_v25  ;;  %v876_v31 = vadd.f32 %v875_v29, %v714_v26  ;;  %v877_v33 = vpop.f32.mrb[19].mxu0 }
 0x1c9   : > { %965 = vst [vmem:[#allocation2 + $0x88] sm:$0xff] %v933_v27  ;;  %v878_v34 = vadd.f32 %v877_v33, %v716_v30  ;;  %v1018_v33 = vlaneseq (!%p1342_p6) }
 0x1ca   : > { %v934_v35 = vadd.f32 %v876_v31, %v388_v28  ;;  %v720_v36 = vpop.f32.mrb[20].mxu1  ;;  %v401_v28 = vld [vmem:[#allocation2 + $0xf8] sm:$0xff] }
 0x1cb   : > { %v935_v37 = vadd.f32 %v878_v34, %v389_v32  ;;  %v881_v39 = vpop.f32.mrb[20].mxu0  ;;  %v722_v40 = vpop.f32.mrb[21].mxu1  ;;  %v1019_v34 = vshrl.u32 (!%p1342_p6), %v1018_v33, 7  ;;  %v1073_v33 = vld [vmem:[#allocation8 + $0x68] sm:$0xff] (!%p1342_p6) }
 0x1cc   : > { %966 = vst [vmem:[#allocation2 + $0x90] sm:$0xff] %v934_v35  ;;  %v882_v41 = vadd.f32 %v881_v39, %v720_v36  ;;  %v883_v43 = vpop.f32.mrb[21].mxu0  ;;  %v1016_v35 = vld [vmem:[%s2279_s2] sm:$0x3] (!%p1342_p6) }
 0x1cd   : > { %967 = vst [vmem:[#allocation2 + $0x98] sm:$0xff] %v935_v37  ;;  %v884_v44 = vadd.f32 %v883_v43, %v722_v40  ;;  %v984_v36 = vld [vmem:[#allocation2] sm:$0xff] (!%p1342_p6)  ;;  %v1020_v37 = vsub.s32 (!%p1342_p6), 0, %v1019_v34  ;;  %v1024_v39 = vsub.s32 (!%p1342_p6), 1, %v1019_v34  ;;  %v987_v43 = vld [vmem:[#allocation2 + $0x18] sm:$0xff] (!%p1342_p6)  ;;  %v1074_v34 = vld [vmem:[#allocation8 + $0x70] sm:$0xff] (!%p1342_p6) }
 0x1ce   : > { %v936_v45 = vadd.f32 %v882_v41, %v390_v38  ;;  %v726_v46 = vpop.f32.mrb[22].mxu1  ;;  %v985_v38 = vld [vmem:[#allocation2 + $0x8] sm:$0xff] (!%p1342_p6)  ;;  %v1060_v40 = vld [vmem:[#allocation8] sm:$0xff] (!%p1342_p6) }
 0x1cf   : > { %v937_v47 = vadd.f32 %v884_v44, %v391_v42  ;;  %v887_v49 = vpop.f32.mrb[22].mxu0  ;;  %v728_v50 = vpop.f32.mrb[23].mxu1  ;;  %v1061_v41 = vld [vmem:[#allocation8 + $0x8] sm:$0xff] (!%p1342_p6)  ;;  %v986_v42 = vld [vmem:[#allocation2 + $0x10] sm:$0xff] (!%p1342_p6)  ;;  %v988_v44 = vld [vmem:[#allocation2 + $0x20] sm:$0xff] (!%p1342_p6) }
 0x1d0   : > { %968 = vst [vmem:[#allocation2 + $0xa0] sm:$0xff] %v936_v45  ;;  %v888_v51 = vadd.f32 %v887_v49, %v726_v46  ;;  %v889_v53 = vpop.f32.mrb[23].mxu0  ;;  %v2200_v45 = vrot.slane (!%p1342_p6), %v1016_v35, %v1020_v37  ;;  %v2202_v46 = vrot.slane (!%p1342_p6), %v1016_v35, %v1024_v39  ;;  %v991_v49 = vld [vmem:[#allocation2 + $0x38] sm:$0xff] (!%p1342_p6) }
 0x1d1   : > { %969 = vst [vmem:[#allocation2 + $0xa8] sm:$0xff] %v937_v47  ;;  %v890_v54 = vadd.f32 %v889_v53, %v728_v50  ;;  %v989_v47 = vld [vmem:[#allocation2 + $0x28] sm:$0xff] (!%p1342_p6)  ;;  %v1062_v50 = vld [vmem:[#allocation8 + $0x10] sm:$0xff] (!%p1342_p6)  ;;  %v1075_v35 = vld [vmem:[#allocation8 + $0x78] sm:$0xff] (!%p1342_p6) }
 0x1d2   : > { %v938_v55 = vadd.f32 %v888_v51, %v392_v48  ;;  %v732_v56 = vpop.f32.mrb[24].mxu1  ;;  %v990_v48 = vld [vmem:[#allocation2 + $0x30] sm:$0xff] (!%p1342_p6)  ;;  %v1063_v51 = vld [vmem:[#allocation8 + $0x18] sm:$0xff] (!%p1342_p6)  ;;  %v1028_v53 = vadd.f32 (!%p1342_p6), %v2200_v45, %v984_v36 }
 0x1d3   : > { %v939_v57 = vadd.f32 %v890_v54, %v393_v52  ;;  %v893_v59 = vpop.f32.mrb[24].mxu0  ;;  %v734_v60 = vpop.f32.mrb[25].mxu1  ;;  %v1064_v52 = vld [vmem:[#allocation8 + $0x20] sm:$0xff] (!%p1342_p6)  ;;  %v1029_v54 = vadd.f32 (!%p1342_p6), %v2202_v46, %v985_v38 }
 0x1d4   : > { %970 = vst [vmem:[#allocation2 + $0xb0] sm:$0xff] %v938_v55  ;;  %v894_v61 = vadd.f32 %v893_v59, %v732_v56  ;;  %v895_v63 = vpop.f32.mrb[25].mxu0  ;;  %v1030_v55 = vadd.f32 (!%p1342_p6), %v2200_v45, %v986_v42  ;;  %v1031_v56 = vadd.f32 (!%p1342_p6), %v2202_v46, %v987_v43  ;;  %v1067_v59 = vld [vmem:[#allocation8 + $0x38] sm:$0xff] (!%p1342_p6) }
 0x1d5   : > { %971 = vst [vmem:[#allocation2 + $0xb8] sm:$0xff] %v939_v57  ;;  %v896_v0 = vadd.f32 %v895_v63, %v734_v60  ;;  %v1065_v57 = vld [vmem:[#allocation8 + $0x28] sm:$0xff] (!%p1342_p6)  ;;  %v1032_v60 = vadd.f32 (!%p1342_p6), %v2200_v45, %v988_v44  ;;  %v1035_v63 = vadd.f32 (!%p1342_p6), %v2202_v46, %v991_v49  ;;  %v1000_v44 = vld [vmem:[#allocation2 + $0x80] sm:$0xff] (!%p1342_p6) }
 0x1d6   : > { %v940_v1 = vadd.f32 %v894_v61, %v394_v58  ;;  %v738_v2 = vpop.f32.mrb[26].mxu1  ;;  %v1066_v58 = vld [vmem:[#allocation8 + $0x30] sm:$0xff] (!%p1342_p6)  ;;  %v1033_v61 = vadd.f32 (!%p1342_p6), %v2202_v46, %v989_v47  ;;  %v1001_v47 = vld [vmem:[#allocation2 + $0x88] sm:$0xff] (!%p1342_p6) }
 0x1d7   : > { %v941_v3 = vadd.f32 %v896_v0, %v395_v62  ;;  %v899_v5 = vpop.f32.mrb[26].mxu0  ;;  %v740_v6 = vpop.f32.mrb[27].mxu1  ;;  %v1034_v62 = vadd.f32 (!%p1342_p6), %v2200_v45, %v990_v48  ;;  %v1092_v0 = vadd.f32 (!%p1342_p6), %v1060_v40, %v1028_v53  ;;  %v1002_v48 = vld [vmem:[#allocation2 + $0x90] sm:$0xff] (!%p1342_p6)  ;;  %v1076_v53 = vld [vmem:[#allocation8 + $0x80] sm:$0xff] (!%p1342_p6) }
 0x1d8   : > { %972 = vst [vmem:[#allocation2 + $0xc0] sm:$0xff] %v940_v1  ;;  %v900_v7 = vadd.f32 %v899_v5, %v738_v2  ;;  %v901_v9 = vpop.f32.mrb[27].mxu0  ;;  %v1093_v1 = vadd.f32 (!%p1342_p6), %v1061_v41, %v1029_v54  ;;  %v1094_v2 = vadd.f32 (!%p1342_p6), %v1062_v50, %v1030_v55  ;;  %v993_v5 = vld [vmem:[#allocation2 + $0x48] sm:$0xff] (!%p1342_p6)  ;;  %v1078_v55 = vld [vmem:[#allocation8 + $0x90] sm:$0xff] (!%p1342_p6) }
 0x1d9   : > { %973 = vst [vmem:[#allocation2 + $0xc8] sm:$0xff] %v941_v3  ;;  %v902_v10 = vadd.f32 %v901_v9, %v740_v6  ;;  %v1095_v3 = vadd.f32 (!%p1342_p6), %v1063_v51, %v1031_v56  ;;  %v994_v6 = vld [vmem:[#allocation2 + $0x50] sm:$0xff] (!%p1342_p6)  ;;  %v1098_v9 = vadd.f32 (!%p1342_p6), %v1066_v58, %v1034_v62  ;;  %v1077_v54 = vld [vmem:[#allocation8 + $0x88] sm:$0xff] (!%p1342_p6)  ;;  %v1003_v56 = vld [vmem:[#allocation2 + $0x98] sm:$0xff] (!%p1342_p6) }
 0x1da   : > { %v942_v11 = vadd.f32 %v900_v7, %v396_v4  ;;  %v744_v12 = vpop.f32.mrb[28].mxu1  ;;  %v992_v4 = vld [vmem:[#allocation2 + $0x40] sm:$0xff] (!%p1342_p6)  ;;  %v1096_v7 = vadd.f32 (!%p1342_p6), %v1064_v52, %v1032_v60  ;;  %v1005_v58 = vld [vmem:[#allocation2 + $0xa8] sm:$0xff] (!%p1342_p6) }
 0x1db   : > { %v943_v13 = vadd.f32 %v902_v10, %v397_v8  ;;  %v905_v15 = vpop.f32.mrb[28].mxu0  ;;  %v746_v16 = vpop.f32.mrb[29].mxu1  ;;  %v1097_v8 = vadd.f32 (!%p1342_p6), %v1065_v57, %v1033_v61  ;;  %v1099_v10 = vadd.f32 (!%p1342_p6), %v1067_v59, %v1035_v63  ;;  %v1004_v57 = vld [vmem:[#allocation2 + $0xa0] sm:$0xff] (!%p1342_p6)  ;;  %v1006_v63 = vld [vmem:[#allocation2 + $0xb0] sm:$0xff] (!%p1342_p6) }
 0x1dc   : > { %974 = vst [vmem:[#allocation2 + $0xd0] sm:$0xff] %v942_v11  ;;  %v906_v17 = vadd.f32 %v905_v15, %v744_v12  ;;  %v907_v19 = vpop.f32.mrb[29].mxu0  ;;  %v1068_v11 = vld [vmem:[#allocation8 + $0x40] sm:$0xff] (!%p1342_p6)  ;;  %v1069_v12 = vld [vmem:[#allocation8 + $0x48] sm:$0xff] (!%p1342_p6) }
 0x1dd   : > { %975 = vst [vmem:[#allocation2 + $0xd8] sm:$0xff] %v943_v13  ;;  %v908_v20 = vadd.f32 %v907_v19, %v746_v16  ;;  %v1070_v13 = vld [vmem:[#allocation8 + $0x50] sm:$0xff] (!%p1342_p6)  ;;  %v996_v15 = vld [vmem:[#allocation2 + $0x60] sm:$0xff] (!%p1342_p6)  ;;  %v997_v16 = vld [vmem:[#allocation2 + $0x68] sm:$0xff] (!%p1342_p6)  ;;  %v1126_v19 = vmax.f32 (!%p1342_p6), %v1094_v2, 0.0 }
 0x1de   : > { %v944_v21 = vadd.f32 %v906_v17, %v398_v14  ;;  %v750_v22 = vpop.f32.mrb[30].mxu1  ;;  %v995_v14 = vld [vmem:[#allocation2 + $0x58] sm:$0xff] (!%p1342_p6)  ;;  %v1124_v17 = vmax.f32 (!%p1342_p6), %v1092_v0, 0.0  ;;  %v1040_v36 = vadd.f32 (!%p1342_p6), %v2200_v45, %v996_v15  ;;  %v1041_v37 = vadd.f32 (!%p1342_p6), %v2202_v46, %v997_v16 }
 0x1df   : > { %v945_v23 = vadd.f32 %v908_v20, %v399_v18  ;;  %v911_v25 = vpop.f32.mrb[30].mxu0  ;;  %v752_v26 = vpop.f32.mrb[31].mxu1  ;;  %983 = sbr.rel (%p1342_p6) target bundleno = 504 (0x1f8), region = 56  ;;  %v1125_v18 = vmax.f32 (!%p1342_p6), %v1093_v1, 0.0  ;;  %v1127_v20 = vmax.f32 (!%p1342_p6), %v1095_v3, 0.0  ;;  %1158 = vst [vmem:[#allocation9 + $0x10] sm:$0xff] (!%p1342_p6), %v1126_v19  ;;  %v1049_v15 = vadd.f32 (!%p1342_p6), %v2202_v46, %v1005_v58 }
 0x1e0   : > { %976 = vst [vmem:[#allocation2 + $0xe0] sm:$0xff] %v944_v21  ;;  %v912_v27 = vadd.f32 %v911_v25, %v750_v22  ;;  %v913_v29 = vpop.f32.mrb[31].mxu0  ;;  %v998_v21 = vld [vmem:[#allocation2 + $0x70] sm:$0xff] (!%p1342_p6)  ;;  %v999_v22 = vld [vmem:[#allocation2 + $0x78] sm:$0xff] (!%p1342_p6)  ;;  %v1130_v25 = vmax.f32 (!%p1342_p6), %v1098_v9, 0.0  ;;  %1156 = vst [vmem:[#allocation9] sm:$0xff] (!%p1342_p6), %v1124_v17  ;;  %v1105_v50 = vadd.f32 (!%p1342_p6), %v1073_v33, %v1041_v37  ;;  %v1046_v9 = vadd.f32 (!%p1342_p6), %v2200_v45, %v1002_v48 }
 0x1e1   : > { %977 = vst [vmem:[#allocation2 + $0xe8] sm:$0xff] %v945_v23  ;;  %v914_v30 = vadd.f32 %v913_v29, %v752_v26  ;;  %v1128_v23 = vmax.f32 (!%p1342_p6), %v1096_v7, 0.0  ;;  %v1131_v26 = vmax.f32 (!%p1342_p6), %v1099_v10, 0.0  ;;  %1157 = vst [vmem:[#allocation9 + $0x8] sm:$0xff] (!%p1342_p6), %v1125_v18  ;;  %v1036_v29 = vadd.f32 (!%p1342_p6), %v2200_v45, %v992_v4  ;;  %v1007_v0 = vld [vmem:[#allocation2 + $0xb8] sm:$0xff] (!%p1342_p6)  ;;  %v1088_v48 = vld [vmem:[#allocation8 + $0xe0] sm:$0xff] (!%p1342_p6) }
 0x1e2   : > { %v946_v31 = vadd.f32 %v912_v27, %v400_v24  ;;  %v1129_v24 = vmax.f32 (!%p1342_p6), %v1097_v8, 0.0  ;;  %v1071_v27 = vld [vmem:[#allocation8 + $0x58] sm:$0xff] (!%p1342_p6)  ;;  %1159 = vst [vmem:[#allocation9 + $0x18] sm:$0xff] (!%p1342_p6), %v1127_v20  ;;  %1162 = vst [vmem:[#allocation9 + $0x30] sm:$0xff] (!%p1342_p6), %v1130_v25  ;;  %v1042_v38 = vadd.f32 (!%p1342_p6), %v2200_v45, %v998_v21  ;;  %v1043_v39 = vadd.f32 (!%p1342_p6), %v2202_v46, %v999_v22  ;;  %v1008_v22 = vld [vmem:[#allocation2 + $0xc0] sm:$0xff] (!%p1342_p6) }
 0x1e3   : > { %v947_v32 = vadd.f32 %v914_v30, %v401_v28  ;;  %v1072_v28 = vld [vmem:[#allocation8 + $0x60] sm:$0xff] (!%p1342_p6)  ;;  %v1037_v30 = vadd.f32 (!%p1342_p6), %v2202_v46, %v993_v5  ;;  %1160 = vst [vmem:[#allocation9 + $0x20] sm:$0xff] (!%p1342_p6), %v1128_v23  ;;  %1163 = vst [vmem:[#allocation9 + $0x38] sm:$0xff] (!%p1342_p6), %v1131_v26  ;;  %v1100_v40 = vadd.f32 (!%p1342_p6), %v1068_v11, %v1036_v29  ;;  %v1137_v2 = vmax.f32 (!%p1342_p6), %v1105_v50, 0.0  ;;  %v1079_v5 = vld [vmem:[#allocation8 + $0x98] sm:$0xff] (!%p1342_p6) }
 0x1e4   : > { %978 = vst [vmem:[#allocation2 + $0xf0] sm:$0xff] %v946_v31  ;;  %v1038_v31 = vadd.f32 (!%p1342_p6), %v2200_v45, %v994_v6  ;;  %1161 = vst [vmem:[#allocation9 + $0x28] sm:$0xff] (!%p1342_p6), %v1129_v24  ;;  %v1104_v49 = vadd.f32 (!%p1342_p6), %v1072_v28, %v1040_v36  ;;  %v1106_v51 = vadd.f32 (!%p1342_p6), %v1074_v34, %v1042_v38  ;;  %v1080_v6 = vld [vmem:[#allocation8 + $0xa0] sm:$0xff] (!%p1342_p6)  ;;  %v1081_v11 = vld [vmem:[#allocation8 + $0xa8] sm:$0xff] (!%p1342_p6) }
 0x1e5   : > { %979 = vst [vmem:[#allocation2 + $0xf8] sm:$0xff] %v947_v32  ;;  %v1039_v32 = vadd.f32 (!%p1342_p6), %v2202_v46, %v995_v14  ;;  %v1101_v41 = vadd.f32 (!%p1342_p6), %v1069_v12, %v1037_v30  ;;  %v1107_v52 = vadd.f32 (!%p1342_p6), %v1075_v35, %v1043_v39  ;;  %v1132_v59 = vmax.f32 (!%p1342_p6), %v1100_v40, 0.0  ;;  %v1082_v12 = vld [vmem:[#allocation8 + $0xb0] sm:$0xff] (!%p1342_p6)  ;;  %1169 = vst [vmem:[#allocation9 + $0x68] sm:$0xff] (!%p1342_p6), %v1137_v2  ;;  %v1009_v23 = vld [vmem:[#allocation2 + $0xc8] sm:$0xff] (!%p1342_p6) }
 0x1e6   : > { %v1102_v42 = vadd.f32 %v1070_v13, %v1038_v31  ;;  %v1136_v1 = vmax.f32 %v1104_v49, 0.0  ;;  %v1138_v3 = vmax.f32 %v1106_v51, 0.0  ;;  %v1044_v7 = vadd.f32 %v2200_v45, %v1000_v44  ;;  %v1083_v13 = vld [vmem:[#allocation8 + $0xb8] sm:$0xff]  ;;  %v1010_v24 = vld [vmem:[#allocation2 + $0xd0] sm:$0xff]  ;;  %v1084_v29 = vld [vmem:[#allocation8 + $0xc0] sm:$0xff] }
 0x1e7   : > { %v1103_v43 = vadd.f32 %v1071_v27, %v1039_v32  ;;  %v1133_v60 = vmax.f32 %v1101_v41, 0.0  ;;  %v1139_v4 = vmax.f32 %v1107_v52, 0.0  ;;  %1164 = vst [vmem:[#allocation9 + $0x40] sm:$0xff] %v1132_v59  ;;  %v1045_v8 = vadd.f32 %v2202_v46, %v1001_v47  ;;  %v1085_v30 = vld [vmem:[#allocation8 + $0xc8] sm:$0xff]  ;;  %v1086_v31 = vld [vmem:[#allocation8 + $0xd0] sm:$0xff]  ;;  %v1011_v32 = vld [vmem:[#allocation2 + $0xd8] sm:$0xff] }
 0x1e8   : > { %v1134_v61 = vmax.f32 %v1102_v42, 0.0  ;;  %v1047_v10 = vadd.f32 %v2202_v46, %v1003_v56  ;;  %1168 = vst [vmem:[#allocation9 + $0x60] sm:$0xff] %v1136_v1  ;;  %1170 = vst [vmem:[#allocation9 + $0x70] sm:$0xff] %v1138_v3  ;;  %v1048_v14 = vadd.f32 %v2200_v45, %v1004_v57  ;;  %v1050_v16 = vadd.f32 %v2200_v45, %v1006_v63  ;;  %v1012_v33 = vld [vmem:[#allocation2 + $0xe0] sm:$0xff]  ;;  %v1013_v34 = vld [vmem:[#allocation2 + $0xe8] sm:$0xff] }
 0x1e9   : > { %v1135_v62 = vmax.f32 %v1103_v43, 0.0  ;;  %1165 = vst [vmem:[#allocation9 + $0x48] sm:$0xff] %v1133_v60  ;;  %1171 = vst [vmem:[#allocation9 + $0x78] sm:$0xff] %v1139_v4  ;;  %v1051_v17 = vadd.f32 %v2202_v46, %v1007_v0  ;;  %v1108_v18 = vadd.f32 %v1076_v53, %v1044_v7  ;;  %v1109_v19 = vadd.f32 %v1077_v54, %v1045_v8  ;;  %v1087_v47 = vld [vmem:[#allocation8 + $0xd8] sm:$0xff]  ;;  %v1089_v53 = vld [vmem:[#allocation8 + $0xe8] sm:$0xff] }
 0x1ea   : > { %1166 = vst [vmem:[#allocation9 + $0x50] sm:$0xff] %v1134_v61  ;;  %v1110_v20 = vadd.f32 %v1078_v55, %v1046_v9  ;;  %v1111_v21 = vadd.f32 %v1079_v5, %v1047_v10  ;;  %v1112_v25 = vadd.f32 %v1080_v6, %v1048_v14  ;;  %v1113_v26 = vadd.f32 %v1081_v11, %v1049_v15  ;;  %v1090_v54 = vld [vmem:[#allocation8 + $0xf0] sm:$0xff]  ;;  %v1091_v55 = vld [vmem:[#allocation8 + $0xf8] sm:$0xff] }
 0x1eb   : > { %1167 = vst [vmem:[#allocation9 + $0x58] sm:$0xff] %v1135_v62  ;;  %v1114_v27 = vadd.f32 %v1082_v12, %v1050_v16  ;;  %v1115_v28 = vadd.f32 %v1083_v13, %v1051_v17  ;;  %v1140_v35 = vmax.f32 %v1108_v18, 0.0  ;;  %v1141_v36 = vmax.f32 %v1109_v19, 0.0  ;;  %v1014_v39 = vld [vmem:[#allocation2 + $0xf0] sm:$0xff] }
 0x1ec   : > { %v1142_v37 = vmax.f32 %v1110_v20, 0.0  ;;  %v1143_v38 = vmax.f32 %v1111_v21, 0.0  ;;  %v1015_v40 = vld [vmem:[#allocation2 + $0xf8] sm:$0xff]  ;;  %v1144_v41 = vmax.f32 %v1112_v25, 0.0  ;;  %v1145_v42 = vmax.f32 %v1113_v26, 0.0 }
 0x1ed   : > { %v1146_v43 = vmax.f32 %v1114_v27, 0.0  ;;  %v1147_v44 = vmax.f32 %v1115_v28, 0.0  ;;  %1172 = vst [vmem:[#allocation9 + $0x80] sm:$0xff] %v1140_v35  ;;  %1173 = vst [vmem:[#allocation9 + $0x88] sm:$0xff] %v1141_v36  ;;  %v1052_v49 = vadd.f32 %v2200_v45, %v1008_v22  ;;  %v1053_v50 = vadd.f32 %v2202_v46, %v1009_v23 }
 0x1ee   : > { %1174 = vst [vmem:[#allocation9 + $0x90] sm:$0xff] %v1142_v37  ;;  %1175 = vst [vmem:[#allocation9 + $0x98] sm:$0xff] %v1143_v38  ;;  %v1054_v51 = vadd.f32 %v2200_v45, %v1010_v24  ;;  %v1055_v52 = vadd.f32 %v2202_v46, %v1011_v32  ;;  %v1056_v56 = vadd.f32 %v2200_v45, %v1012_v33 }
 0x1ef   : > { %1176 = vst [vmem:[#allocation9 + $0xa0] sm:$0xff] %v1144_v41  ;;  %1177 = vst [vmem:[#allocation9 + $0xa8] sm:$0xff] %v1145_v42  ;;  %v1057_v57 = vadd.f32 %v2202_v46, %v1013_v34  ;;  %v1058_v58 = vadd.f32 %v2200_v45, %v1014_v39  ;;  %v1059_v59 = vadd.f32 %v2202_v46, %v1015_v40 }
 0x1f0   : > { %1178 = vst [vmem:[#allocation9 + $0xb0] sm:$0xff] %v1146_v43  ;;  %1179 = vst [vmem:[#allocation9 + $0xb8] sm:$0xff] %v1147_v44  ;;  %v1116_v60 = vadd.f32 %v1084_v29, %v1052_v49  ;;  %v1117_v61 = vadd.f32 %v1085_v30, %v1053_v50  ;;  %v1118_v62 = vadd.f32 %v1086_v31, %v1054_v51 }
 0x1f1   : > { %v1119_v63 = vadd.f32 %v1087_v47, %v1055_v52  ;;  %v1120_v0 = vadd.f32 %v1088_v48, %v1056_v56  ;;  %v1121_v1 = vadd.f32 %v1089_v53, %v1057_v57  ;;  %v1122_v2 = vadd.f32 %v1090_v54, %v1058_v58 }
 0x1f2   : > { %v1123_v3 = vadd.f32 %v1091_v55, %v1059_v59  ;;  %v1148_v4 = vmax.f32 %v1116_v60, 0.0  ;;  %v1149_v5 = vmax.f32 %v1117_v61, 0.0  ;;  %v1150_v6 = vmax.f32 %v1118_v62, 0.0 }
 0x1f3   : > { %v1151_v7 = vmax.f32 %v1119_v63, 0.0  ;;  %v1152_v8 = vmax.f32 %v1120_v0, 0.0  ;;  %v1153_v9 = vmax.f32 %v1121_v1, 0.0  ;;  %v1154_v10 = vmax.f32 %v1122_v2, 0.0 }
 0x1f4   : > { %v1155_v11 = vmax.f32 %v1123_v3, 0.0  ;;  %1180 = vst [vmem:[#allocation9 + $0xc0] sm:$0xff] %v1148_v4  ;;  %1181 = vst [vmem:[#allocation9 + $0xc8] sm:$0xff] %v1149_v5 }
 0x1f5   : > { %1182 = vst [vmem:[#allocation9 + $0xd0] sm:$0xff] %v1150_v6  ;;  %1183 = vst [vmem:[#allocation9 + $0xd8] sm:$0xff] %v1151_v7 }
 0x1f6   : > { %1184 = vst [vmem:[#allocation9 + $0xe0] sm:$0xff] %v1152_v8  ;;  %1185 = vst [vmem:[#allocation9 + $0xe8] sm:$0xff] %v1153_v9 }
 0x1f7   : > { %1186 = vst [vmem:[#allocation9 + $0xf0] sm:$0xff] %v1154_v10  ;;  %1187 = vst [vmem:[#allocation9 + $0xf8] sm:$0xff] %v1155_v11 }
 0x1f8 PF: > { %p1536_p8 = scmp.eq.s32.totalorder %s1840_s21, 1  ;;  %s1783_s18 = smov [#allocation9]  }
 0x1f9   : > { %s1200_s27 = sshll.u32 %s1783_s18, 4  ;;  %s1201_s27 = int_to_ptr.vmem [resolvable:$true] %s1200_s27 }
 0x1fa   : > { %s1684_s9 = scalar_lea.vmem %s1201_s27, 4096  ;;  %p1691_p0 = scmp.lt.s32.totalorder %s1201_s27, %s1201_s27 }
 0x1fb   : > { %p1685_p13 = scmp.ne.s32.totalorder %s1201_s27, %s1684_s9  ;;  %p1692_p4 = scmp.lt.s32.totalorder %s1684_s9, %s1684_s9 }
 0x1fd   : > { %p1686_p1 = pnand %p1685_p13, %p1536_p8  ;;  %p1693_p7 = por %p1692_p4, %p1691_p0 }
 0x1ff   : > { %p1687_p2 = pneg %p1686_p1 }
 0x201   : > { %p1694_p9 = pnand %p1693_p7, %p1687_p2 }
 0x203   : > { %1697 = shalt.err (!%p1694_p9)
}
 0x204   : > { %s1698_s12 = scalar_lea.hbm %s2281_s4, 4096 }
 0x205   : > { %p1699_p12 = scmp.ne.s32.totalorder %s2281_s4, %s1698_s12  ;;  %p1704_p10 = scmp.lt.u32.totalorder %s1698_s12, %s2281_s4 }
 0x207   : > { %p1700_p5 = pnand %p1699_p12, %p1536_p8 }
 0x209   : > { %p1701_p11 = pneg %p1700_p5 }
 0x20b   : > { %p1706_p3 = pnand %p1704_p10, %p1701_p11 }
 0x20d   : > { %1709 = shalt.err (!%p1706_p3)
}
 0x20e   : > { %s1784_s7 = smov 256   ;;  %s1785_s26 = smov 16  }
 0x20f   : > { %1519 = dma.vmem_to_hbm [thread:$0]  (%p1536_p8), %s1201_s27, 4096, %s2281_s4, [#allocation5], %s1784_s7, %s1784_s7, %s1785_s26  }
 0x210   : > { %1747 = dma.done.wait (%p1536_p8), [#allocation5], 4096  }
 0x211   : > { %1749 = vsyncadd (%p1536_p8), [#allocation5], 4294963200 }
 0x212 PF: > { %s21_s20 = sadd.s32 1, %s1772_s20   ;;  %s2303_s15 = smov %s1756_s16 }
 0x213   : > { %p18_p6 = scmp.ge.s32.totalorder %s21_s20, 4   ;;  %s2304_s16 = smov %s1760_s17 }
 0x214   : > { %s2305_s17 = smov %s1910_s10  ;;  %s2306_s18 = smov %s1768_s19 }
 0x215   : > { %s2307_s19 = smov %s2309_s29  ;;  %20 = sbr.rel (!%p18_p6) target bundleno = 10 (0xa), region = 103 }
 0x21c   :  { %1216 = vsyncpa [#allocation4], 1 }
 0x21d   :  { %1218 = vsyncpa [#allocation4 + $0x1], 1 }
 0x21e   :  { %1219 = vsyncpa [#allocation7], 1 }
 0x21f   :  { %1221 = vsyncpa [#allocation7 + $0x1], 1 }
 0x220   :  { %1222 = vsyncpa [#allocation5], 1 }
 0x221   :  { %1224 = vsyncpa [#allocation5 + $0x1], 1 }

</bundles_post_ra>
